<compile_context>
chip_gen: v7x
topology: tpu7x:2x2x1
jax: 0.10.0
libtpu: 0.0.40
codegen_flags: <defaults>
</compile_context>

<pallas_src>
import functools
import math

import numpy as np

import jax
import jax.numpy as jnp
from jax.experimental import pallas as pl
from jax.experimental.pallas import tpu as pltpu


def _round_up(n, m):
    return ((n + m - 1) // m) * m


# -----------------------------------------------------------------------------
# Pallas kernel: MixVPR aggregator for one (batch, channel-chunk) grid step.
#   x_ref   : (hw_p, Cc)          bf16  feature-map chunk, transposed, HW padded
#   w1      : (depth, hid_p, hw_p) bf16 (LayerNorm affine pre-folded)
#   b1      : (depth, hid_p, 1)   f32
#   w2      : (depth, hw_p, hid_p) bf16
#   b2      : (depth, hw_p, 1)    f32
#   wr      : (R, hw_p)           f32   row_proj weight (zero-padded cols)
#   wct     : (Cc, OC)            f32   channel_proj weight chunk, transposed
#   out_ref : (R, OC)             f32   partial head product Wr @ X_c @ Wc_c^T
#                                       (folded bias + L2 normalize in wrapper)
# -----------------------------------------------------------------------------
def mixvpr_kernel(x_ref, w1_ref, b1_ref, w2_ref, b2_ref, wr_ref, wct_ref,
                  out_ref, *, mix_depth, hw_true, eps):
    x = x_ref[...].astype(jnp.float32)                        # (hw_p, Cc), one upcast
    hw_p = x.shape[0]
    n_pad = hw_p - hw_true
    inv_hw = 1.0 / float(hw_true)

    # FeatureMixerLayer stack: x = x + Linear2(ReLU(Linear1(LayerNorm(x)))),
    # acting along the HW axis (rows).  Padded HW rows of x stay exactly zero
    # (w2 pad rows and b2 pad rows are zero).
    for d in range(mix_depth):
        # LayerNorm over the true HW extent.  Padded rows of x are zero, so the
        # mean is exact; the two-pass variance only needs the n_pad*mu^2 term.
        mu = jnp.sum(x, axis=0, keepdims=True) * inv_hw       # (1, Cc)
        xc = x - mu
        ss = jnp.sum(xc * xc, axis=0, keepdims=True)
        if n_pad:
            ss = ss - float(n_pad) * (mu * mu)
        var = jnp.maximum(ss * inv_hw, 0.0)
        xn = xc * jax.lax.rsqrt(var + eps)                    # (hw_p, Cc)
        # LayerNorm affine is folded into w1/b1; w1's padded HW columns are
        # zero, so the nonzero padded rows of xn never reach the residual.
        h = jnp.dot(w1_ref[d], xn.astype(jnp.bfloat16),
                    preferred_element_type=jnp.float32)       # (hid_p, Cc)
        h = jnp.maximum(h + b1_ref[d], 0.0)
        x = x + jnp.dot(w2_ref[d], h.astype(jnp.bfloat16),
                        preferred_element_type=jnp.float32) + b2_ref[d]

    # Reassociated projection head, kept in f32 (tiny: R output rows).
    t = jnp.dot(wr_ref[...], x, preferred_element_type=jnp.float32)       # (R, Cc)
    out_ref[...] = jnp.dot(t, wct_ref[...], preferred_element_type=jnp.float32)


def _vmem_limit_bytes():
    # ~3/4 of physical VMEM: ~96 MiB on 128-MiB parts (v5e/v6e), 48 MiB on v7x.
    try:
        cap = pltpu.get_tpu_info().vmem_capacity_bytes
    except Exception:
        return None
    return int(min(100 * 1024 * 1024, (3 * cap) // 4))


def _default_c_splits(batch, channels):
    # Dual-TensorCore parts (v7x, v4 megacore): split the channel (lane) axis so
    # both cores stay busy for single-image inference.  No benefit on 1-TC chips.
    if batch >= 2 or channels % 256 != 0:
        return 1
    try:
        kind = jax.devices()[0].device_kind.lower()
    except Exception:
        return 1
    return 2 if ("7x" in kind or "v7" in kind or "v4" in kind) else 1


def mixvpr_forward(x_feat, kp, *, eps=1e-5, c_splits=None):
    """x_feat: backbone feature map (B, C, H, W); kp: prepare_kernel_params()."""
    B, C, H, W = x_feat.shape
    hw = H * W
    mix_depth, _hid_p, hw_p = kp["w1"].shape
    R, OC = kp["hb"].shape
    assert hw_p >= hw and kp["wct"].shape[0] == C

    if c_splits is None:
        c_splits = _default_c_splits(B, C)
    if C % c_splits != 0 or (c_splits > 1 and (C // c_splits) % 128 != 0):
        c_splits = 1
    cc = C // c_splits

    # (B, C, H, W) -> (B, HW, C) in bf16 (halves kernel input DMA; the kernel
    # upcasts once), zero-pad HW to the sublane-aligned hw_p.
    xt = jnp.transpose(x_feat.reshape(B, C, hw), (0, 2, 1)).astype(jnp.bfloat16)
    if hw_p > hw:
        xt = jnp.pad(xt, ((0, 0), (0, hw_p - hw), (0, 0)))

    weight_names = ("w1", "b1", "w2", "b2", "wr", "wct")
    weights = [kp[k] for k in weight_names]

    kernel = functools.partial(mixvpr_kernel, mix_depth=mix_depth,
                               hw_true=hw, eps=eps)

    def call(single_buffer_weights):
        def invariant_spec(shape):
            nd = len(shape)
            kw = {"pipeline_mode": pl.Buffered(1)} if single_buffer_weights else {}
            return pl.BlockSpec(shape, lambda b, c, _nd=nd: (0,) * _nd, **kw)

        in_specs = [pl.BlockSpec((pl.Squeezed(), hw_p, cc), lambda b, c: (b, 0, c))]
        for name, w in zip(weight_names, weights):
            if name == "wct":
                # Split along C when c_splits > 1 (then it is not grid-invariant).
                kw = ({"pipeline_mode": pl.Buffered(1)}
                      if single_buffer_weights and c_splits == 1 else {})
                in_specs.append(pl.BlockSpec((cc, OC), lambda b, c: (c, 0), **kw))
            else:
                in_specs.append(invariant_spec(w.shape))

        return pl.pallas_call(
            kernel,
            out_shape=jax.ShapeDtypeStruct((B, c_splits, R, OC), jnp.float32),
            grid=(B, c_splits),
            in_specs=in_specs,
            out_specs=pl.BlockSpec((pl.Squeezed(), pl.Squeezed(), R, OC),
                                   lambda b, c: (b, c, 0, 0)),
            compiler_params=pltpu.CompilerParams(
                dimension_semantics=("parallel", "parallel"),
                vmem_limit_bytes=_vmem_limit_bytes()),
        )(xt, *weights)

    try:
        out = call(True)          # single-buffer the grid-invariant weights
    except Exception:
        out = call(False)         # pipeline_mode=Buffered(1) unsupported: fall back

    # Tiny epilogue (B x R x OC floats): sum channel-chunk partials, add the
    # folded head bias, match torch's flatten order (OC-major), L2-normalize.
    z = jnp.sum(out, axis=1) + kp["hb"][None]                     # (B, R, OC)
    flat = jnp.transpose(z, (0, 2, 1)).reshape(B, OC * R)
    nrm = jnp.maximum(jnp.linalg.norm(flat, axis=-1, keepdims=True), 1e-12)
    return {"global": flat / nrm}


# -----------------------------------------------------------------------------
# Parameter construction (mirrors MixVPR.__init__) and kernel-side preparation.
# -----------------------------------------------------------------------------
def init_mixvpr_params(key, *, in_channels, in_h, in_w, out_channels,
                       mix_depth, mlp_ratio, out_rows):
    """Torch-layout parameters (f32, unpadded)."""
    hw = in_h * in_w
    hidden = int(hw * mlp_ratio)
    ks = jax.random.split(key, 2 * mix_depth + 4)

    def trunc(k, shape):  # nn.init.trunc_normal_(std=0.02), biases zero
        return 0.02 * jax.random.truncated_normal(k, -2.0, 2.0, shape, jnp.float32)

    w1 = jnp.stack([trunc(ks[2 * d], (hidden, hw)) for d in range(mix_depth)])
    w2 = jnp.stack([trunc(ks[2 * d + 1], (hw, hidden)) for d in range(mix_depth)])

    def linear_default(kw, kb, out_f, in_f):  # torch nn.Linear default init
        bound = 1.0 / math.sqrt(in_f)
        w = jax.random.uniform(kw, (out_f, in_f), jnp.float32, -bound, bound)
        b = jax.random.uniform(kb, (out_f,), jnp.float32, -bound, bound)
        return w, b

    wc, bc = linear_default(ks[-4], ks[-3], out_channels, in_channels)
    wr, br = linear_default(ks[-2], ks[-1], out_rows, hw)

    return {
        "ln_w": jnp.ones((mix_depth, hw), jnp.float32),
        "ln_b": jnp.zeros((mix_depth, hw), jnp.float32),
        "w1": w1, "b1": jnp.zeros((mix_depth, hidden), jnp.float32),
        "w2": w2, "b2": jnp.zeros((mix_depth, hw), jnp.float32),
        "wc": wc, "bc": bc, "wr": wr, "br": br,
    }


def prepare_kernel_params(p, *, sublane=8):
    """Fold, pad, transpose and cast torch-layout params for the Pallas kernel."""
    _depth, hidden, hw = p["w1"].shape
    hw_p, hid_p = _round_up(hw, sublane), _round_up(hidden, sublane)
    dhw, dhid = hw_p - hw, hid_p - hidden

    # Fold the LayerNorm affine into the first mixer linear:
    #   w1' = w1 * ln_w (per HW column),  b1' = b1 + w1 @ ln_b
    w1f = p["w1"] * p["ln_w"][:, None, :]
    b1f = p["b1"] + jnp.einsum("dkh,dh->dk", p["w1"], p["ln_b"])

    return {
        "w1": jnp.pad(w1f, ((0, 0), (0, dhid), (0, dhw))).astype(jnp.bfloat16),
        "b1": jnp.pad(b1f, ((0, 0), (0, dhid)))[:, :, None].astype(jnp.float32),
        "w2": jnp.pad(p["w2"], ((0, 0), (0, dhw), (0, dhid))).astype(jnp.bfloat16),
        "b2": jnp.pad(p["b2"], ((0, 0), (0, dhw)))[:, :, None].astype(jnp.float32),
        # Projection head stays f32: with R=4 the MXU is idle there anyway, and
        # it feeds the L2-normalized descriptor directly.
        "wr": jnp.pad(p["wr"], ((0, 0), (0, dhw))).astype(jnp.float32),
        "wct": p["wc"].T.astype(jnp.float32),                          # (C, OC)
        # Folded head bias: z^T += rowsum(Wr) (x) bc + br (exact reassociation);
        # added in the wrapper epilogue together with the channel-chunk sum.
        "hb": (jnp.sum(p["wr"], axis=1)[:, None] * p["bc"][None, :]
               + p["br"][:, None]).astype(jnp.float32),                # (R, OC)
    }


# -----------------------------------------------------------------------------
# Pure-JAX f32 reference of the torch math (for correctness check).
# -----------------------------------------------------------------------------
def reference(x_feat, p, eps=1e-5):
    B, C, H, W = x_feat.shape
    x = x_feat.reshape(B, C, H * W).astype(jnp.float32)
    mix_depth = p["w1"].shape[0]
    for d in range(mix_depth):
        mu = x.mean(-1, keepdims=True)
        var = ((x - mu) ** 2).mean(-1, keepdims=True)
        xn = (x - mu) / jnp.sqrt(var + eps) * p["ln_w"][d] + p["ln_b"][d]
        h = jnp.maximum(jnp.einsum("bch,kh->bck", xn, p["w1"][d]) + p["b1"][d], 0.0)
        x = x + jnp.einsum("bck,hk->bch", h, p["w2"][d]) + p["b2"][d]
    a = jnp.einsum("bch,oc->boh", x, p["wc"]) + p["bc"][None, :, None]
    z = jnp.einsum("boh,rh->bor", a, p["wr"]) + p["br"][None, None, :]
    flat = z.reshape(B, -1)
    nrm = jnp.maximum(jnp.linalg.norm(flat, axis=-1, keepdims=True), 1e-12)
    return flat / nrm


if __name__ == "__main__":
    key = jax.random.PRNGKey(0)

    # Config 1: B=2, no channel split (standard path on 1-TC parts).
    # Config 2: B=1 with an explicit 2-way channel split (the dual-TensorCore
    # path for v7x/v4-class parts); forced here so both grid layouts are
    # exercised regardless of which chip this runs on.
    configs = [
        (dict(in_channels=128, in_h=8, in_w=8, out_channels=128,
              mix_depth=2, mlp_ratio=1, out_rows=4), 2, None),
        (dict(in_channels=256, in_h=8, in_w=8, out_channels=128,
              mix_depth=1, mlp_ratio=1, out_rows=4), 1, 2),
    ]

    for cfg, B, c_splits in configs:
        key, pkey, xkey = jax.random.split(key, 3)
        params = init_mixvpr_params(pkey, **cfg)
        kparams = prepare_kernel_params(params)

        # Backbone feature-map stand-in (see TODO(synk) at top of file).
        x_feat = jax.random.normal(
            xkey, (B, cfg["in_channels"], cfg["in_h"], cfg["in_w"]), jnp.float32)

        out = mixvpr_forward(x_feat, kparams, c_splits=c_splits)
        glob = jax.block_until_ready(out["global"])

        assert glob.shape == (B, cfg["out_channels"] * cfg["out_rows"])
        ref = reference(x_feat, params)
        # bf16 input + bf16 mixer MXU operands (f32 accumulation) vs. pure-f32 ref.
        np.testing.assert_allclose(np.asarray(glob), np.asarray(ref),
                                   rtol=5e-2, atol=3e-3)

    print("KERNEL_OK")
</pallas_src>

<mosaic_0001>
module attributes {stable_mosaic.version = 11 : i64} {
  func.func @mixvpr_kernel(%arg0: i32, %arg1: i32, %arg2: memref<1x64x128xbf16, #tpu.memory_space<vmem>>, %arg3: memref<2x64x64xbf16, #tpu.memory_space<vmem>>, %arg4: memref<2x64x1xf32, #tpu.memory_space<vmem>>, %arg5: memref<2x64x64xbf16, #tpu.memory_space<vmem>>, %arg6: memref<2x64x1xf32, #tpu.memory_space<vmem>>, %arg7: memref<4x64xf32, #tpu.memory_space<vmem>>, %arg8: memref<128x128xf32, #tpu.memory_space<vmem>>, %arg9: memref<1x1x4x128xf32, #tpu.memory_space<vmem>>) attributes {dimension_semantics = [#tpu.dimension_semantics<parallel>, #tpu.dimension_semantics<parallel>], iteration_bounds = array<i64: 2, 1>, scalar_prefetch = 0 : i64, scratch_operands = 0 : i64, tpu.core_type = #tpu.core_type<tc>, window_params = [{transform_indices = @transform_0, window_bounds = array<i64: 1, 64, 128>}, {pipeline_mode = #tpu.pipeline_mode<synchronous>, transform_indices = @transform_1, window_bounds = array<i64: 2, 64, 64>}, {pipeline_mode = #tpu.pipeline_mode<synchronous>, transform_indices = @transform_2, window_bounds = array<i64: 2, 64, 1>}, {pipeline_mode = #tpu.pipeline_mode<synchronous>, transform_indices = @transform_3, window_bounds = array<i64: 2, 64, 64>}, {pipeline_mode = #tpu.pipeline_mode<synchronous>, transform_indices = @transform_4, window_bounds = array<i64: 2, 64, 1>}, {pipeline_mode = #tpu.pipeline_mode<synchronous>, transform_indices = @transform_5, window_bounds = array<i64: 4, 64>}, {pipeline_mode = #tpu.pipeline_mode<synchronous>, transform_indices = @transform_6, window_bounds = array<i64: 128, 128>}, {transform_indices = @transform_7, window_bounds = array<i64: 1, 1, 4, 128>}]} {
    %c0 = arith.constant 0 : index
    %c0_0 = arith.constant 0 : index
    %c0_1 = arith.constant 0 : index
    %0 = vector.load %arg2[%c0, %c0_0, %c0_1] : memref<1x64x128xbf16, #tpu.memory_space<vmem>>, vector<1x64x128xbf16>
    %1 = vector.shape_cast %0 : vector<1x64x128xbf16> to vector<64x128xbf16>
    %2 = arith.extf %1 : vector<64x128xbf16> to vector<64x128xf32>
    %cst = arith.constant dense<0.000000e+00> : vector<128xf32>
    %3 = vector.multi_reduction <add>, %2, %cst [0] : vector<64x128xf32> to vector<128xf32>
    %4 = vector.shape_cast %3 : vector<128xf32> to vector<1x128xf32>
    %cst_2 = arith.constant 1.562500e-02 : f32
    %5 = vector.broadcast %cst_2 : f32 to vector<1x128xf32>
    %6 = arith.mulf %4, %5 : vector<1x128xf32>
    %7 = vector.broadcast %6 : vector<1x128xf32> to vector<64x128xf32>
    %8 = arith.subf %2, %7 : vector<64x128xf32>
    %9 = arith.mulf %8, %8 : vector<64x128xf32>
    %cst_3 = arith.constant dense<0.000000e+00> : vector<128xf32>
    %10 = vector.multi_reduction <add>, %9, %cst_3 [0] : vector<64x128xf32> to vector<128xf32>
    %11 = vector.shape_cast %10 : vector<128xf32> to vector<1x128xf32>
    %cst_4 = arith.constant 1.562500e-02 : f32
    %12 = vector.broadcast %cst_4 : f32 to vector<1x128xf32>
    %13 = arith.mulf %11, %12 : vector<1x128xf32>
    %cst_5 = arith.constant 0.000000e+00 : f32
    %14 = vector.broadcast %cst_5 : f32 to vector<1x128xf32>
    %15 = arith.maximumf %13, %14 : vector<1x128xf32>
    %cst_6 = arith.constant 9.99999974E-6 : f32
    %16 = vector.broadcast %cst_6 : f32 to vector<1x128xf32>
    %17 = arith.addf %15, %16 : vector<1x128xf32>
    %18 = math.rsqrt %17 : vector<1x128xf32>
    %19 = vector.broadcast %18 : vector<1x128xf32> to vector<64x128xf32>
    %20 = arith.mulf %8, %19 : vector<64x128xf32>
    %c0_7 = arith.constant 0 : index
    %c0_8 = arith.constant 0 : index
    %c0_9 = arith.constant 0 : index
    %21 = vector.load %arg3[%c0_7, %c0_8, %c0_9] : memref<2x64x64xbf16, #tpu.memory_space<vmem>>, vector<1x64x64xbf16>
    %22 = vector.shape_cast %21 : vector<1x64x64xbf16> to vector<64x64xbf16>
    %23 = arith.truncf %20 : vector<64x128xf32> to vector<64x128xbf16>
    %cst_10 = arith.constant dense<0.000000e+00> : vector<64x128xf32>
    %24 = tpu.matmul %22, %23, %cst_10 {dimension_numbers = #tpu.dot_dimension_numbers<[1], [0], [0], [1], [0, 0, 1, 1], [], []>} : vector<64x64xbf16>, vector<64x128xbf16>, vector<64x128xf32> -> vector<64x128xf32>
    %c0_11 = arith.constant 0 : index
    %c0_12 = arith.constant 0 : index
    %c0_13 = arith.constant 0 : index
    %25 = vector.load %arg4[%c0_11, %c0_12, %c0_13] : memref<2x64x1xf32, #tpu.memory_space<vmem>>, vector<1x64x1xf32>
    %26 = vector.shape_cast %25 : vector<1x64x1xf32> to vector<64x1xf32>
    %27 = vector.broadcast %26 : vector<64x1xf32> to vector<64x128xf32>
    %28 = arith.addf %24, %27 : vector<64x128xf32>
    %cst_14 = arith.constant 0.000000e+00 : f32
    %29 = vector.broadcast %cst_14 : f32 to vector<64x128xf32>
    %30 = arith.maximumf %28, %29 : vector<64x128xf32>
    %c0_15 = arith.constant 0 : index
    %c0_16 = arith.constant 0 : index
    %c0_17 = arith.constant 0 : index
    %31 = vector.load %arg5[%c0_15, %c0_16, %c0_17] : memref<2x64x64xbf16, #tpu.memory_space<vmem>>, vector<1x64x64xbf16>
    %32 = vector.shape_cast %31 : vector<1x64x64xbf16> to vector<64x64xbf16>
    %33 = arith.truncf %30 : vector<64x128xf32> to vector<64x128xbf16>
    %cst_18 = arith.constant dense<0.000000e+00> : vector<64x128xf32>
    %34 = tpu.matmul %32, %33, %cst_18 {dimension_numbers = #tpu.dot_dimension_numbers<[1], [0], [0], [1], [0, 0, 1, 1], [], []>} : vector<64x64xbf16>, vector<64x128xbf16>, vector<64x128xf32> -> vector<64x128xf32>
    %35 = arith.addf %2, %34 : vector<64x128xf32>
    %c0_19 = arith.constant 0 : index
    %c0_20 = arith.constant 0 : index
    %c0_21 = arith.constant 0 : index
    %36 = vector.load %arg6[%c0_19, %c0_20, %c0_21] : memref<2x64x1xf32, #tpu.memory_space<vmem>>, vector<1x64x1xf32>
    %37 = vector.shape_cast %36 : vector<1x64x1xf32> to vector<64x1xf32>
    %38 = vector.broadcast %37 : vector<64x1xf32> to vector<64x128xf32>
    %39 = arith.addf %35, %38 : vector<64x128xf32>
    %cst_22 = arith.constant dense<0.000000e+00> : vector<128xf32>
    %40 = vector.multi_reduction <add>, %39, %cst_22 [0] : vector<64x128xf32> to vector<128xf32>
    %41 = vector.shape_cast %40 : vector<128xf32> to vector<1x128xf32>
    %cst_23 = arith.constant 1.562500e-02 : f32
    %42 = vector.broadcast %cst_23 : f32 to vector<1x128xf32>
    %43 = arith.mulf %41, %42 : vector<1x128xf32>
    %44 = vector.broadcast %43 : vector<1x128xf32> to vector<64x128xf32>
    %45 = arith.subf %39, %44 : vector<64x128xf32>
    %46 = arith.mulf %45, %45 : vector<64x128xf32>
    %cst_24 = arith.constant dense<0.000000e+00> : vector<128xf32>
    %47 = vector.multi_reduction <add>, %46, %cst_24 [0] : vector<64x128xf32> to vector<128xf32>
    %48 = vector.shape_cast %47 : vector<128xf32> to vector<1x128xf32>
    %cst_25 = arith.constant 1.562500e-02 : f32
    %49 = vector.broadcast %cst_25 : f32 to vector<1x128xf32>
    %50 = arith.mulf %48, %49 : vector<1x128xf32>
    %cst_26 = arith.constant 0.000000e+00 : f32
    %51 = vector.broadcast %cst_26 : f32 to vector<1x128xf32>
    %52 = arith.maximumf %50, %51 : vector<1x128xf32>
    %cst_27 = arith.constant 9.99999974E-6 : f32
    %53 = vector.broadcast %cst_27 : f32 to vector<1x128xf32>
    %54 = arith.addf %52, %53 : vector<1x128xf32>
    %55 = math.rsqrt %54 : vector<1x128xf32>
    %56 = vector.broadcast %55 : vector<1x128xf32> to vector<64x128xf32>
    %57 = arith.mulf %45, %56 : vector<64x128xf32>
    %c1 = arith.constant 1 : index
    %c0_28 = arith.constant 0 : index
    %c0_29 = arith.constant 0 : index
    %58 = vector.load %arg3[%c1, %c0_28, %c0_29] : memref<2x64x64xbf16, #tpu.memory_space<vmem>>, vector<1x64x64xbf16>
    %59 = vector.shape_cast %58 : vector<1x64x64xbf16> to vector<64x64xbf16>
    %60 = arith.truncf %57 : vector<64x128xf32> to vector<64x128xbf16>
    %cst_30 = arith.constant dense<0.000000e+00> : vector<64x128xf32>
    %61 = tpu.matmul %59, %60, %cst_30 {dimension_numbers = #tpu.dot_dimension_numbers<[1], [0], [0], [1], [0, 0, 1, 1], [], []>} : vector<64x64xbf16>, vector<64x128xbf16>, vector<64x128xf32> -> vector<64x128xf32>
    %c1_31 = arith.constant 1 : index
    %c0_32 = arith.constant 0 : index
    %c0_33 = arith.constant 0 : index
    %62 = vector.load %arg4[%c1_31, %c0_32, %c0_33] : memref<2x64x1xf32, #tpu.memory_space<vmem>>, vector<1x64x1xf32>
    %63 = vector.shape_cast %62 : vector<1x64x1xf32> to vector<64x1xf32>
    %64 = vector.broadcast %63 : vector<64x1xf32> to vector<64x128xf32>
    %65 = arith.addf %61, %64 : vector<64x128xf32>
    %cst_34 = arith.constant 0.000000e+00 : f32
    %66 = vector.broadcast %cst_34 : f32 to vector<64x128xf32>
    %67 = arith.maximumf %65, %66 : vector<64x128xf32>
    %c1_35 = arith.constant 1 : index
    %c0_36 = arith.constant 0 : index
    %c0_37 = arith.constant 0 : index
    %68 = vector.load %arg5[%c1_35, %c0_36, %c0_37] : memref<2x64x64xbf16, #tpu.memory_space<vmem>>, vector<1x64x64xbf16>
    %69 = vector.shape_cast %68 : vector<1x64x64xbf16> to vector<64x64xbf16>
    %70 = arith.truncf %67 : vector<64x128xf32> to vector<64x128xbf16>
    %cst_38 = arith.constant dense<0.000000e+00> : vector<64x128xf32>
    %71 = tpu.matmul %69, %70, %cst_38 {dimension_numbers = #tpu.dot_dimension_numbers<[1], [0], [0], [1], [0, 0, 1, 1], [], []>} : vector<64x64xbf16>, vector<64x128xbf16>, vector<64x128xf32> -> vector<64x128xf32>
    %72 = arith.addf %39, %71 : vector<64x128xf32>
    %c1_39 = arith.constant 1 : index
    %c0_40 = arith.constant 0 : index
    %c0_41 = arith.constant 0 : index
    %73 = vector.load %arg6[%c1_39, %c0_40, %c0_41] : memref<2x64x1xf32, #tpu.memory_space<vmem>>, vector<1x64x1xf32>
    %74 = vector.shape_cast %73 : vector<1x64x1xf32> to vector<64x1xf32>
    %75 = vector.broadcast %74 : vector<64x1xf32> to vector<64x128xf32>
    %76 = arith.addf %72, %75 : vector<64x128xf32>
    %c0_42 = arith.constant 0 : index
    %c0_43 = arith.constant 0 : index
    %77 = vector.load %arg7[%c0_42, %c0_43] : memref<4x64xf32, #tpu.memory_space<vmem>>, vector<4x64xf32>
    %cst_44 = arith.constant dense<0.000000e+00> : vector<4x128xf32>
    %78 = tpu.matmul %77, %76, %cst_44 {dimension_numbers = #tpu.dot_dimension_numbers<[1], [0], [0], [1], [0, 0, 1, 1], [], []>} : vector<4x64xf32>, vector<64x128xf32>, vector<4x128xf32> -> vector<4x128xf32>
    %c0_45 = arith.constant 0 : index
    %c0_46 = arith.constant 0 : index
    %79 = vector.load %arg8[%c0_45, %c0_46] : memref<128x128xf32, #tpu.memory_space<vmem>>, vector<128x128xf32>
    %cst_47 = arith.constant dense<0.000000e+00> : vector<4x128xf32>
    %80 = tpu.matmul %78, %79, %cst_47 {dimension_numbers = #tpu.dot_dimension_numbers<[1], [0], [0], [1], [0, 0, 1, 1], [], []>} : vector<4x128xf32>, vector<128x128xf32>, vector<4x128xf32> -> vector<4x128xf32>
    %c0_48 = arith.constant 0 : index
    %c0_49 = arith.constant 0 : index
    %c0_50 = arith.constant 0 : index
    %c0_51 = arith.constant 0 : index
    %81 = vector.load %arg9[%c0_48, %c0_49, %c0_50, %c0_51] : memref<1x1x4x128xf32, #tpu.memory_space<vmem>>, vector<1x1x4x128xf32>
    %82 = vector.shape_cast %81 : vector<1x1x4x128xf32> to vector<4x128xf32>
    %83 = vector.shape_cast %80 : vector<4x128xf32> to vector<1x1x4x128xf32>
    tpu.vector_store %arg9[%c0_48, %c0_49, %c0_50, %c0_51], %83 {strides = array<i32>} : memref<1x1x4x128xf32, #tpu.memory_space<vmem>>, vector<1x1x4x128xf32>,
    return
  }
  func.func @transform_0(%arg0: i32, %arg1: i32) -> (i32, i32, i32) {
    %c0_i32 = arith.constant 0 : i32
    %c0_i32_0 = arith.constant 0 : i32
    return %arg0, %c0_i32, %arg1 : i32, i32, i32
  }
  func.func @transform_1(%arg0: i32, %arg1: i32) -> (i32, i32, i32) {
    %c0_i32 = arith.constant 0 : i32
    %c0_i32_0 = arith.constant 0 : i32
    %c0_i32_1 = arith.constant 0 : i32
    %c0_i32_2 = arith.constant 0 : i32
    return %c0_i32, %c0_i32_0, %c0_i32_1 : i32, i32, i32
  }
  func.func @transform_2(%arg0: i32, %arg1: i32) -> (i32, i32, i32) {
    %c0_i32 = arith.constant 0 : i32
    %c0_i32_0 = arith.constant 0 : i32
    %c0_i32_1 = arith.constant 0 : i32
    %c0_i32_2 = arith.constant 0 : i32
    return %c0_i32, %c0_i32_0, %c0_i32_1 : i32, i32, i32
  }
  func.func @transform_3(%arg0: i32, %arg1: i32) -> (i32, i32, i32) {
    %c0_i32 = arith.constant 0 : i32
    %c0_i32_0 = arith.constant 0 : i32
    %c0_i32_1 = arith.constant 0 : i32
    %c0_i32_2 = arith.constant 0 : i32
    return %c0_i32, %c0_i32_0, %c0_i32_1 : i32, i32, i32
  }
  func.func @transform_4(%arg0: i32, %arg1: i32) -> (i32, i32, i32) {
    %c0_i32 = arith.constant 0 : i32
    %c0_i32_0 = arith.constant 0 : i32
    %c0_i32_1 = arith.constant 0 : i32
    %c0_i32_2 = arith.constant 0 : i32
    return %c0_i32, %c0_i32_0, %c0_i32_1 : i32, i32, i32
  }
  func.func @transform_5(%arg0: i32, %arg1: i32) -> (i32, i32) {
    %c0_i32 = arith.constant 0 : i32
    %c0_i32_0 = arith.constant 0 : i32
    %c0_i32_1 = arith.constant 0 : i32
    return %c0_i32, %c0_i32_0 : i32, i32
  }
  func.func @transform_6(%arg0: i32, %arg1: i32) -> (i32, i32) {
    %c0_i32 = arith.constant 0 : i32
    %c0_i32_0 = arith.constant 0 : i32
    return %arg1, %c0_i32 : i32, i32
  }
  func.func @transform_7(%arg0: i32, %arg1: i32) -> (i32, i32, i32, i32) {
    %c0_i32 = arith.constant 0 : i32
    %c0_i32_0 = arith.constant 0 : i32
    %c0_i32_1 = arith.constant 0 : i32
    return %arg0, %arg1, %c0_i32, %c0_i32_0 : i32, i32, i32, i32
  }
}

module attributes {stable_mosaic.version = 11 : i64} {
  func.func @mixvpr_kernel(%arg0: i32, %arg1: i32, %arg2: memref<1x64x128xbf16, #tpu.memory_space<vmem>>, %arg3: memref<2x64x64xbf16, #tpu.memory_space<vmem>>, %arg4: memref<2x64x1xf32, #tpu.memory_space<vmem>>, %arg5: memref<2x64x64xbf16, #tpu.memory_space<vmem>>, %arg6: memref<2x64x1xf32, #tpu.memory_space<vmem>>, %arg7: memref<4x64xf32, #tpu.memory_space<vmem>>, %arg8: memref<128x128xf32, #tpu.memory_space<vmem>>, %arg9: memref<1x1x4x128xf32, #tpu.memory_space<vmem>>) attributes {dimension_semantics = [#tpu.dimension_semantics<parallel>, #tpu.dimension_semantics<parallel>], iteration_bounds = array<i64: 2, 1>, scalar_prefetch = 0 : i64, scratch_operands = 0 : i64, tpu.core_type = #tpu.core_type<tc>, window_params = [{transform_indices = @transform_0, window_bounds = array<i64: 1, 64, 128>}, {pipeline_mode = #tpu.pipeline_mode<synchronous>, transform_indices = @transform_1, window_bounds = array<i64: 2, 64, 64>}, {pipeline_mode = #tpu.pipeline_mode<synchronous>, transform_indices = @transform_2, window_bounds = array<i64: 2, 64, 1>}, {pipeline_mode = #tpu.pipeline_mode<synchronous>, transform_indices = @transform_3, window_bounds = array<i64: 2, 64, 64>}, {pipeline_mode = #tpu.pipeline_mode<synchronous>, transform_indices = @transform_4, window_bounds = array<i64: 2, 64, 1>}, {pipeline_mode = #tpu.pipeline_mode<synchronous>, transform_indices = @transform_5, window_bounds = array<i64: 4, 64>}, {transform_indices = @transform_6, window_bounds = array<i64: 128, 128>}, {transform_indices = @transform_7, window_bounds = array<i64: 1, 1, 4, 128>}]} {
    %c0 = arith.constant 0 : index
    %c0_0 = arith.constant 0 : index
    %c0_1 = arith.constant 0 : index
    %0 = vector.load %arg2[%c0, %c0_0, %c0_1] : memref<1x64x128xbf16, #tpu.memory_space<vmem>>, vector<1x64x128xbf16>
    %1 = vector.shape_cast %0 : vector<1x64x128xbf16> to vector<64x128xbf16>
    %2 = arith.extf %1 : vector<64x128xbf16> to vector<64x128xf32>
    %cst = arith.constant dense<0.000000e+00> : vector<128xf32>
    %3 = vector.multi_reduction <add>, %2, %cst [0] : vector<64x128xf32> to vector<128xf32>
    %4 = vector.shape_cast %3 : vector<128xf32> to vector<1x128xf32>
    %cst_2 = arith.constant 1.562500e-02 : f32
    %5 = vector.broadcast %cst_2 : f32 to vector<1x128xf32>
    %6 = arith.mulf %4, %5 : vector<1x128xf32>
    %7 = vector.broadcast %6 : vector<1x128xf32> to vector<64x128xf32>
    %8 = arith.subf %2, %7 : vector<64x128xf32>
    %9 = arith.mulf %8, %8 : vector<64x128xf32>
    %cst_3 = arith.constant dense<0.000000e+00> : vector<128xf32>
    %10 = vector.multi_reduction <add>, %9, %cst_3 [0] : vector<64x128xf32> to vector<128xf32>
    %11 = vector.shape_cast %10 : vector<128xf32> to vector<1x128xf32>
    %cst_4 = arith.constant 1.562500e-02 : f32
    %12 = vector.broadcast %cst_4 : f32 to vector<1x128xf32>
    %13 = arith.mulf %11, %12 : vector<1x128xf32>
    %cst_5 = arith.constant 0.000000e+00 : f32
    %14 = vector.broadcast %cst_5 : f32 to vector<1x128xf32>
    %15 = arith.maximumf %13, %14 : vector<1x128xf32>
    %cst_6 = arith.constant 9.99999974E-6 : f32
    %16 = vector.broadcast %cst_6 : f32 to vector<1x128xf32>
    %17 = arith.addf %15, %16 : vector<1x128xf32>
    %18 = math.rsqrt %17 : vector<1x128xf32>
    %19 = vector.broadcast %18 : vector<1x128xf32> to vector<64x128xf32>
    %20 = arith.mulf %8, %19 : vector<64x128xf32>
    %c0_7 = arith.constant 0 : index
    %c0_8 = arith.constant 0 : index
    %c0_9 = arith.constant 0 : index
    %21 = vector.load %arg3[%c0_7, %c0_8, %c0_9] : memref<2x64x64xbf16, #tpu.memory_space<vmem>>, vector<1x64x64xbf16>
    %22 = vector.shape_cast %21 : vector<1x64x64xbf16> to vector<64x64xbf16>
    %23 = arith.truncf %20 : vector<64x128xf32> to vector<64x128xbf16>
    %cst_10 = arith.constant dense<0.000000e+00> : vector<64x128xf32>
    %24 = tpu.matmul %22, %23, %cst_10 {dimension_numbers = #tpu.dot_dimension_numbers<[1], [0], [0], [1], [0, 0, 1, 1], [], []>} : vector<64x64xbf16>, vector<64x128xbf16>, vector<64x128xf32> -> vector<64x128xf32>
    %c0_11 = arith.constant 0 : index
    %c0_12 = arith.constant 0 : index
    %c0_13 = arith.constant 0 : index
    %25 = vector.load %arg4[%c0_11, %c0_12, %c0_13] : memref<2x64x1xf32, #tpu.memory_space<vmem>>, vector<1x64x1xf32>
    %26 = vector.shape_cast %25 : vector<1x64x1xf32> to vector<64x1xf32>
    %27 = vector.broadcast %26 : vector<64x1xf32> to vector<64x128xf32>
    %28 = arith.addf %24, %27 : vector<64x128xf32>
    %cst_14 = arith.constant 0.000000e+00 : f32
    %29 = vector.broadcast %cst_14 : f32 to vector<64x128xf32>
    %30 = arith.maximumf %28, %29 : vector<64x128xf32>
    %c0_15 = arith.constant 0 : index
    %c0_16 = arith.constant 0 : index
    %c0_17 = arith.constant 0 : index
    %31 = vector.load %arg5[%c0_15, %c0_16, %c0_17] : memref<2x64x64xbf16, #tpu.memory_space<vmem>>, vector<1x64x64xbf16>
    %32 = vector.shape_cast %31 : vector<1x64x64xbf16> to vector<64x64xbf16>
    %33 = arith.truncf %30 : vector<64x128xf32> to vector<64x128xbf16>
    %cst_18 = arith.constant dense<0.000000e+00> : vector<64x128xf32>
    %34 = tpu.matmul %32, %33, %cst_18 {dimension_numbers = #tpu.dot_dimension_numbers<[1], [0], [0], [1], [0, 0, 1, 1], [], []>} : vector<64x64xbf16>, vector<64x128xbf16>, vector<64x128xf32> -> vector<64x128xf32>
    %35 = arith.addf %2, %34 : vector<64x128xf32>
    %c0_19 = arith.constant 0 : index
    %c0_20 = arith.constant 0 : index
    %c0_21 = arith.constant 0 : index
    %36 = vector.load %arg6[%c0_19, %c0_20, %c0_21] : memref<2x64x1xf32, #tpu.memory_space<vmem>>, vector<1x64x1xf32>
    %37 = vector.shape_cast %36 : vector<1x64x1xf32> to vector<64x1xf32>
    %38 = vector.broadcast %37 : vector<64x1xf32> to vector<64x128xf32>
    %39 = arith.addf %35, %38 : vector<64x128xf32>
    %cst_22 = arith.constant dense<0.000000e+00> : vector<128xf32>
    %40 = vector.multi_reduction <add>, %39, %cst_22 [0] : vector<64x128xf32> to vector<128xf32>
    %41 = vector.shape_cast %40 : vector<128xf32> to vector<1x128xf32>
    %cst_23 = arith.constant 1.562500e-02 : f32
    %42 = vector.broadcast %cst_23 : f32 to vector<1x128xf32>
    %43 = arith.mulf %41, %42 : vector<1x128xf32>
    %44 = vector.broadcast %43 : vector<1x128xf32> to vector<64x128xf32>
    %45 = arith.subf %39, %44 : vector<64x128xf32>
    %46 = arith.mulf %45, %45 : vector<64x128xf32>
    %cst_24 = arith.constant dense<0.000000e+00> : vector<128xf32>
    %47 = vector.multi_reduction <add>, %46, %cst_24 [0] : vector<64x128xf32> to vector<128xf32>
    %48 = vector.shape_cast %47 : vector<128xf32> to vector<1x128xf32>
    %cst_25 = arith.constant 1.562500e-02 : f32
    %49 = vector.broadcast %cst_25 : f32 to vector<1x128xf32>
    %50 = arith.mulf %48, %49 : vector<1x128xf32>
    %cst_26 = arith.constant 0.000000e+00 : f32
    %51 = vector.broadcast %cst_26 : f32 to vector<1x128xf32>
    %52 = arith.maximumf %50, %51 : vector<1x128xf32>
    %cst_27 = arith.constant 9.99999974E-6 : f32
    %53 = vector.broadcast %cst_27 : f32 to vector<1x128xf32>
    %54 = arith.addf %52, %53 : vector<1x128xf32>
    %55 = math.rsqrt %54 : vector<1x128xf32>
    %56 = vector.broadcast %55 : vector<1x128xf32> to vector<64x128xf32>
    %57 = arith.mulf %45, %56 : vector<64x128xf32>
    %c1 = arith.constant 1 : index
    %c0_28 = arith.constant 0 : index
    %c0_29 = arith.constant 0 : index
    %58 = vector.load %arg3[%c1, %c0_28, %c0_29] : memref<2x64x64xbf16, #tpu.memory_space<vmem>>, vector<1x64x64xbf16>
    %59 = vector.shape_cast %58 : vector<1x64x64xbf16> to vector<64x64xbf16>
    %60 = arith.truncf %57 : vector<64x128xf32> to vector<64x128xbf16>
    %cst_30 = arith.constant dense<0.000000e+00> : vector<64x128xf32>
    %61 = tpu.matmul %59, %60, %cst_30 {dimension_numbers = #tpu.dot_dimension_numbers<[1], [0], [0], [1], [0, 0, 1, 1], [], []>} : vector<64x64xbf16>, vector<64x128xbf16>, vector<64x128xf32> -> vector<64x128xf32>
    %c1_31 = arith.constant 1 : index
    %c0_32 = arith.constant 0 : index
    %c0_33 = arith.constant 0 : index
    %62 = vector.load %arg4[%c1_31, %c0_32, %c0_33] : memref<2x64x1xf32, #tpu.memory_space<vmem>>, vector<1x64x1xf32>
    %63 = vector.shape_cast %62 : vector<1x64x1xf32> to vector<64x1xf32>
    %64 = vector.broadcast %63 : vector<64x1xf32> to vector<64x128xf32>
    %65 = arith.addf %61, %64 : vector<64x128xf32>
    %cst_34 = arith.constant 0.000000e+00 : f32
    %66 = vector.broadcast %cst_34 : f32 to vector<64x128xf32>
    %67 = arith.maximumf %65, %66 : vector<64x128xf32>
    %c1_35 = arith.constant 1 : index
    %c0_36 = arith.constant 0 : index
    %c0_37 = arith.constant 0 : index
    %68 = vector.load %arg5[%c1_35, %c0_36, %c0_37] : memref<2x64x64xbf16, #tpu.memory_space<vmem>>, vector<1x64x64xbf16>
    %69 = vector.shape_cast %68 : vector<1x64x64xbf16> to vector<64x64xbf16>
    %70 = arith.truncf %67 : vector<64x128xf32> to vector<64x128xbf16>
    %cst_38 = arith.constant dense<0.000000e+00> : vector<64x128xf32>
    %71 = tpu.matmul %69, %70, %cst_38 {dimension_numbers = #tpu.dot_dimension_numbers<[1], [0], [0], [1], [0, 0, 1, 1], [], []>} : vector<64x64xbf16>, vector<64x128xbf16>, vector<64x128xf32> -> vector<64x128xf32>
    %72 = arith.addf %39, %71 : vector<64x128xf32>
    %c1_39 = arith.constant 1 : index
    %c0_40 = arith.constant 0 : index
    %c0_41 = arith.constant 0 : index
    %73 = vector.load %arg6[%c1_39, %c0_40, %c0_41] : memref<2x64x1xf32, #tpu.memory_space<vmem>>, vector<1x64x1xf32>
    %74 = vector.shape_cast %73 : vector<1x64x1xf32> to vector<64x1xf32>
    %75 = vector.broadcast %74 : vector<64x1xf32> to vector<64x128xf32>
    %76 = arith.addf %72, %75 : vector<64x128xf32>
    %c0_42 = arith.constant 0 : index
    %c0_43 = arith.constant 0 : index
    %77 = vector.load %arg7[%c0_42, %c0_43] : memref<4x64xf32, #tpu.memory_space<vmem>>, vector<4x64xf32>
    %cst_44 = arith.constant dense<0.000000e+00> : vector<4x128xf32>
    %78 = tpu.matmul %77, %76, %cst_44 {dimension_numbers = #tpu.dot_dimension_numbers<[1], [0], [0], [1], [0, 0, 1, 1], [], []>} : vector<4x64xf32>, vector<64x128xf32>, vector<4x128xf32> -> vector<4x128xf32>
    %c0_45 = arith.constant 0 : index
    %c0_46 = arith.constant 0 : index
    %79 = vector.load %arg8[%c0_45, %c0_46] : memref<128x128xf32, #tpu.memory_space<vmem>>, vector<128x128xf32>
    %cst_47 = arith.constant dense<0.000000e+00> : vector<4x128xf32>
    %80 = tpu.matmul %78, %79, %cst_47 {dimension_numbers = #tpu.dot_dimension_numbers<[1], [0], [0], [1], [0, 0, 1, 1], [], []>} : vector<4x128xf32>, vector<128x128xf32>, vector<4x128xf32> -> vector<4x128xf32>
    %c0_48 = arith.constant 0 : index
    %c0_49 = arith.constant 0 : index
    %c0_50 = arith.constant 0 : index
    %c0_51 = arith.constant 0 : index
    %81 = vector.load %arg9[%c0_48, %c0_49, %c0_50, %c0_51] : memref<1x1x4x128xf32, #tpu.memory_space<vmem>>, vector<1x1x4x128xf32>
    %82 = vector.shape_cast %81 : vector<1x1x4x128xf32> to vector<4x128xf32>
    %83 = vector.shape_cast %80 : vector<4x128xf32> to vector<1x1x4x128xf32>
    tpu.vector_store %arg9[%c0_48, %c0_49, %c0_50, %c0_51], %83 {strides = array<i32>} : memref<1x1x4x128xf32, #tpu.memory_space<vmem>>, vector<1x1x4x128xf32>,
    return
  }
  func.func @transform_0(%arg0: i32, %arg1: i32) -> (i32, i32, i32) {
    %c0_i32 = arith.constant 0 : i32
    %c0_i32_0 = arith.constant 0 : i32
    return %arg0, %c0_i32, %arg1 : i32, i32, i32
  }
  func.func @transform_1(%arg0: i32, %arg1: i32) -> (i32, i32, i32) {
    %c0_i32 = arith.constant 0 : i32
    %c0_i32_0 = arith.constant 0 : i32
    %c0_i32_1 = arith.constant 0 : i32
    %c0_i32_2 = arith.constant 0 : i32
    return %c0_i32, %c0_i32_0, %c0_i32_1 : i32, i32, i32
  }
  func.func @transform_2(%arg0: i32, %arg1: i32) -> (i32, i32, i32) {
    %c0_i32 = arith.constant 0 : i32
    %c0_i32_0 = arith.constant 0 : i32
    %c0_i32_1 = arith.constant 0 : i32
    %c0_i32_2 = arith.constant 0 : i32
    return %c0_i32, %c0_i32_0, %c0_i32_1 : i32, i32, i32
  }
  func.func @transform_3(%arg0: i32, %arg1: i32) -> (i32, i32, i32) {
    %c0_i32 = arith.constant 0 : i32
    %c0_i32_0 = arith.constant 0 : i32
    %c0_i32_1 = arith.constant 0 : i32
    %c0_i32_2 = arith.constant 0 : i32
    return %c0_i32, %c0_i32_0, %c0_i32_1 : i32, i32, i32
  }
  func.func @transform_4(%arg0: i32, %arg1: i32) -> (i32, i32, i32) {
    %c0_i32 = arith.constant 0 : i32
    %c0_i32_0 = arith.constant 0 : i32
    %c0_i32_1 = arith.constant 0 : i32
    %c0_i32_2 = arith.constant 0 : i32
    return %c0_i32, %c0_i32_0, %c0_i32_1 : i32, i32, i32
  }
  func.func @transform_5(%arg0: i32, %arg1: i32) -> (i32, i32) {
    %c0_i32 = arith.constant 0 : i32
    %c0_i32_0 = arith.constant 0 : i32
    %c0_i32_1 = arith.constant 0 : i32
    return %c0_i32, %c0_i32_0 : i32, i32
  }
  func.func @transform_6(%arg0: i32, %arg1: i32) -> (i32, i32) {
    %c0_i32 = arith.constant 0 : i32
    %c0_i32_0 = arith.constant 0 : i32
    return %arg1, %c0_i32 : i32, i32
  }
  func.func @transform_7(%arg0: i32, %arg1: i32) -> (i32, i32, i32, i32) {
    %c0_i32 = arith.constant 0 : i32
    %c0_i32_0 = arith.constant 0 : i32
    %c0_i32_1 = arith.constant 0 : i32
    return %arg0, %arg1, %c0_i32, %c0_i32_0 : i32, i32, i32, i32
  }
}

</mosaic_0001>

<bundles_post_ra>
// kernel: tpu_custom_call.1
= control target key start
LH: loop header
LB: loop body
LE: loop exit
PB: predicated region body
PF: predicated region fallthrough
CT: control target
= control target key end

     0   :  { %12 = vsyncpa [#allocation3], 0  ;;  %s2447_s0 = inlined_call_operand.vmem [shape: bf16[2,64,128], index: 0, kind: input, shape index: {}]   ;;  %s2448_s1 = inlined_call_operand.vmem [shape: bf16[2,64,64], index: 1, kind: input, shape index: {}]   ;;  %s2449_s2 = inlined_call_operand.vmem [shape: f32[2,64,1], index: 2, kind: input, shape index: {}]   ;;  %s2450_s3 = inlined_call_operand.hbm [shape: bf16[2,64,64], index: 3, kind: input, shape index: {}]   ;;  %s2451_s4 = inlined_call_operand.vmem [shape: f32[2,64,1], index: 4, kind: input, shape index: {}]   ;;  %s2452_s5 = inlined_call_operand.vmem [shape: f32[4,64], index: 5, kind: input, shape index: {}]   ;;  %s2453_s6 = inlined_call_operand.vmem [shape: f32[128,128], index: 6, kind: input, shape index: {}]   ;;  %s2454_s7 = inlined_call_operand.hbm [shape: f32[2,1,4,128], index: 7, kind: output, shape index: {}]  }
   0x1   :  { %13 = vsyncpa [#allocation4], 0 }
   0x2   :  { %15 = vsyncpa [#allocation4 + $0x1], 0  ;;  %s1982_s24 = smov 0   ;;  %s1984_s25 = smov 0  }
   0x3   :  { %s1986_s26 = smov 0   ;;  %s1988_s27 = smov 0  }
   0x4   :  { %s1990_s28 = smov 0   ;;  %s1992_s29 = smov 0  }
   0x5 LB: > { %s1424_s30 = sadd.s32 4294967295, %s1932_s29   ;;  %s1425_s8 = sadd.s32 4294967294, %s1932_s29   ;;  %s1932_s29 = sphi %s1992_s29, %s21_s29   ;;  %s1928_s28 = sphi %s1990_s28, %s2472_s28   ;;  %s1924_s27 = sphi %s1988_s27, %s2471_s27   ;;  %s1920_s26 = sphi %s1986_s26, %s2470_s26   ;;  %s1916_s25 = sphi %s1984_s25, %s2469_s25   ;;  %s1912_s24 = sphi %s1982_s24, %s2468_s24  }
   0x6   : > { %s33_s9 = sadd.s32 1, %s1928_s28  ;;  %s201_s10 = sadd.s32 1, %s1920_s26 }
   0x7   : > { %p35_p0 = scmp.ge.s32.totalorder %s33_s9, 2  ;;  %p211_p1 = scmp.ne.s32.totalorder %s1920_s26, %s1916_s25 }
   0x8   : > { %p212_p2 = scmp.eq.s32.totalorder %s1424_s30, 1  ;;  %p217_p3 = scmp.ne.s32.totalorder %s1916_s25, %s1912_s24 }
   0x9   : > { %s2474_s9 = smov (%p35_p0, %s33_s9), 0  ;;  %p218_p5 = scmp.eq.s32.totalorder %s1425_s8, 1 }
   0xa   : > { %p2022_p4 = por %p212_p2, %p211_p1  ;;  %s196_s12 = ssub.s32 %s1928_s28, %s2474_s9 }
   0xb   : > { %p1426_p6 = scmp.ge.s32.totalorder %s1932_s29, 1  ;;  %p199_p7 = scmp.eq.s32.totalorder %s196_s12, 0 }
   0xc   : > { %s2459_s11 = scalar_select %p2022_p4, 1, 0 }
   0xd   : > { %p2029_p8 = por %p218_p5, %p217_p3  ;;  %p225_p9 = scmp.lt.s32.totalorder %s1932_s29, 3 }
   0xe   : > { %s2035_s14 = scalar_select %p199_p7, %s1920_s26, %s201_s10  }
   0xf   : > { %s2460_s13 = scalar_select %p2029_p8, 1, 0 }
  0x10   : > { %p2037_p10 = pnand %p1426_p6, %p225_p9  ;;  %p2041_p11 = scmp.eq.s32.totalorder %s1424_s30, 0 }
  0x11   : > { %s1934_s17 = smov [#allocation2]   ;;  %s1822_s22 = scalar_lea.hbm %s2450_s3, 1024 }
  0x12   : > { %s2461_s15 = scalar_select %p2037_p10, 1, 0 }
  0x13   : > { %s2462_s16 = scalar_select %p2041_p11, 1, 0 }
  0x14   : > { %p1734_p12 = pneg %p2037_p10  ;;  %s243_s18 = sshll.u32 %s1934_s17, 4  ;;  %s244_s18 = int_to_ptr.vmem [resolvable:$true] %s243_s18 }
  0x15   : > { %p1823_p0 = scmp.ne.s32.totalorder %s2450_s3, %s1822_s22  ;;  %p1829_p5 = scmp.lt.u32.totalorder %s1822_s22, %s2450_s3 }
  0x16   : > { %p2049_p13 = pnand %p2041_p11, %p1734_p12 }
  0x18   : > { %p1824_p1 = pneg %p2049_p13 }
  0x1a   : > { %p1825_p2 = pnand %p1824_p1, %p1823_p0 }
  0x1c   : > { %p1826_p3 = pneg %p1825_p2 }
  0x1e   : > { %p1831_p6 = pnand %p1829_p5, %p1826_p3 }
  0x20   : > { %1834 = shalt.err (!%p1831_p6)
}
  0x21   : > { %s1835_s12 = scalar_lea.vmem %s244_s18, 1024  ;;  %p1843_p8 = scmp.lt.s32.totalorder %s244_s18, %s244_s18 }
  0x22   : > { %p1836_p7 = scmp.ne.s32.totalorder %s244_s18, %s1835_s12  ;;  %p1844_p4 = scmp.lt.s32.totalorder %s1835_s12, %s1835_s12 }
  0x24   : > { %p1838_p9 = pnand %p1836_p7, %p1824_p1  ;;  %p1845_p11 = por %p1844_p4, %p1843_p8 }
  0x26   : > { %p1839_p12 = pneg %p1838_p9 }
  0x28   : > { %p1846_p10 = pnand %p1845_p11, %p1839_p12 }
  0x2a   : > { %1849 = shalt.err (!%p1846_p10)
}
  0x2b   : > { %s1935_s17 = smov 64   ;;  %s1936_s20 = smov 4  }
  0x2c   : > { %1737 = dma.hbm_to_vmem [thread:$0]  (!%p2049_p13), %s2450_s3, 1024, %s244_s18, [#allocation3], %s1935_s17, %s1935_s17, %s1936_s20  }
  0x2d   : > { %p2464_p0 = scmp.ne.s32.totalorder %s2461_s15, 0 }
  0x2e   : > { %p2465_p2 = scmp.ne.s32.totalorder (!%p2464_p0), %s2462_s16, 0 }
  0x2f   : > { %285 = sbr.rel (%p2464_p0) target bundleno = 1621 (0x655), region = 48 }
  0x36   : > { %1903 = dma.done.wait (%p2465_p2), [#allocation3], 1024  }
  0x37   : > { %1905 = vsyncadd (%p2465_p2), [#allocation3], 4294966272  ;;  %p325_p4 = scmp.lt.s32.totalorder %s1924_s27, 1  ;;  %v1937_v0 = vmov 0   ;;  %vm491_vm0 = vcmask 523264   ;;  %v1802_v7 = vld [vmem:[%s2448_s1] sm:$0xff]  }
  0x38   : > { %1800 = vset.pattern.permute.xlu0 %v1937_v0  ;;  %1801 = vset.pattern.permute.xlu1 %v1937_v0  ;;  %v423_v12 = vld [vmem:[%s2449_s2] sm:$0xff]  ;;  %v425_v13 = vld [vmem:[%s2449_s2 + $0x10] sm:$0xff]  ;;  %v424_v17 = vld [vmem:[%s2449_s2 + $0x8] sm:$0xff]  ;;  %vm1939_vm1 = vmmov 0   ;;  %s322_s30 = sand.u32 1, %s1916_s25   ;;  %s1493_s16 = sshll.u32 %s1924_s27, 6 }
  0x39   : > { %s326_s19 = scalar_select %p325_p4, %s1924_s27, 1  ;;  %1582 = vmatprep.mubr.msk.bf16.mxu0 %vm491_vm0, %v1802_v7  ;;  %433 = vperm.xlu0 %1800, %v423_v12   ;;  %v426_v18 = vld [vmem:[%s2449_s2 + $0x18] sm:$0xff]  ;;  %v427_v23 = vld [vmem:[%s2449_s2 + $0x20] sm:$0xff]  ;;  %v428_v24 = vld [vmem:[%s2449_s2 + $0x28] sm:$0xff] }
  0x3a   : > { %443 = vperm.xlu1 %1801, %v425_v13   ;;  %v429_v27 = vld [vmem:[%s2449_s2 + $0x30] sm:$0xff]  ;;  %v430_v28 = vld [vmem:[%s2449_s2 + $0x38] sm:$0xff]  ;;  %v694_v30 = vld [vmem:[%s2451_s4] sm:$0xff]  ;;  %s1432_s8 = sshll.u32 %s322_s30, 2  ;;  %s2402_s17 = scalar_lea.hbm %s2454_s7, %s1493_s16 }
  0x3b   : > { %s1496_s22 = sshll.u32 %s326_s19, 5  ;;  %v695_v31 = vld [vmem:[%s2451_s4 + $0x8] sm:$0xff]  ;;  %v696_v34 = vld [vmem:[%s2451_s4 + $0x10] sm:$0xff]  ;;  %v697_v35 = vld [vmem:[%s2451_s4 + $0x18] sm:$0xff]  ;;  %s1309_s20 = scalar_lea.sflag [#allocation4], %s322_s30 }
  0x3c   : > { %s332_s18 = scalar_lea.vmem %s2447_s0, %s1496_s22  ;;  %v698_v39 = vld [vmem:[%s2451_s4 + $0x20] sm:$0xff]  ;;  %v699_v40 = vld [vmem:[%s2451_s4 + $0x28] sm:$0xff]  ;;  %v700_v46 = vld [vmem:[%s2451_s4 + $0x30] sm:$0xff]  ;;  %p2466_p10 = scmp.ne.s32.totalorder %s2459_s11, 0 }
  0x3d   : > { %v1498_v1 = vld [vmem:[%s332_s18] sm:$0xff]   ;;  %v1513_v2 = vld [vmem:[%s332_s18 + $0x8] sm:$0xff]   ;;  %v1514_v6 = vld [vmem:[%s332_s18 + $0x10] sm:$0xff]   ;;  %438 = vperm.xlu0 %1800, %v424_v17   ;;  %s1941_s27 = smov [#allocation5]  }
  0x3e   : > { %v2080_v3 = vunpack.c.l.bf16 %v1498_v1  ;;  %v2082_v4 = vunpack.c.h.bf16 %v1498_v1  ;;  %v2084_v5 = vunpack.c.l.bf16 %v1513_v2  ;;  %v2089_v8 = vunpack.c.h.bf16 %v1513_v2  ;;  %v1515_v14 = vld [vmem:[%s332_s18 + $0x18] sm:$0xff]   ;;  %448 = vperm.xlu1 %1801, %v426_v18   ;;  %v1459_v55 = vld [vmem:[%s2449_s2 + $0x40] sm:$0xff]  ;;  %v1460_v56 = vld [vmem:[%s2449_s2 + $0x48] sm:$0xff]  ;;  %s324_s18 = scalar_lea.vmem [#allocation5], %s1432_s8  ;;  %s1854_s23 = sshll.u32 %s1941_s27, 4  ;;  %s1855_s23 = int_to_ptr.vmem [resolvable:$false] %s1854_s23 }
  0x3f   : > { %v2094_v10 = vunpack.c.l.bf16 %v1514_v6  ;;  %v2103_v15 = vunpack.c.h.bf16 %v1514_v6  ;;  %v2112_v19 = vunpack.c.l.bf16 %v1515_v14  ;;  %v2115_v21 = vunpack.c.h.bf16 %v1515_v14  ;;  %v701_v47 = vld [vmem:[%s2451_s4 + $0x38] sm:$0xff]  ;;  %v1461_v63 = vld [vmem:[%s2449_s2 + $0x50] sm:$0xff]  ;;  %s1323_s15 = sshll.u32 %s324_s18, 4  ;;  %s1856_s19 = scalar_lea.vmem %s1855_s23, 128  ;;  %s2397_s15 = int_to_ptr.vmem [resolvable:$true] %s1323_s15 }
  0x40   : > { %v356_v9 = vadd.f32 %v2082_v4, %v2080_v3  ;;  %v1462_v0 = vld [vmem:[%s2449_s2 + $0x58] sm:$0xff]  ;;  %v1465_v14 = vld [vmem:[%s2449_s2 + $0x70] sm:$0xff]  ;;  %s1850_s21 = scalar_lea.vmem %s2397_s15, 64  ;;  %p1857_p1 = scmp.lt.s32.totalorder %s2397_s15, %s1855_s23 }
  0x41   : > { %453 = vperm.xlu0 %1800, %v427_v23   ;;  %p1851_p8 = scmp.ne.s32.totalorder %s2397_s15, %s1850_s21  ;;  %p1858_p3 = scmp.lt.s32.totalorder %s1856_s19, %s1850_s21 }
  0x42   : > { %v357_v11 = vadd.f32 %v2084_v5, %v356_v9  ;;  %458 = vperm.xlu1 %1801, %v428_v24   ;;  %v1463_v9 = vld [vmem:[%s2449_s2 + $0x60] sm:$0xff] }
  0x43   : > { %p1852_p11 = pnand %p1851_p8, %p2466_p10  ;;  %p1859_p5 = por %p1858_p3, %p1857_p1 }
  0x44   : > { %v358_v16 = vadd.f32 %v2089_v8, %v357_v11  ;;  %v1464_v11 = vld [vmem:[%s2449_s2 + $0x68] sm:$0xff] }
  0x45   : > { %463 = vperm.xlu0 %1800, %v429_v27   ;;  %p1853_p13 = pneg %p1852_p11 }
  0x46   : > { %v359_v20 = vadd.f32 %v2094_v10, %v358_v16  ;;  %468 = vperm.xlu1 %1801, %v430_v28   ;;  %v1466_v16 = vld [vmem:[%s2449_s2 + $0x78] sm:$0xff] }
  0x47   : > { %p1860_p6 = pnand %p1859_p5, %p1853_p13 }
  0x48   : > { %v360_v22 = vadd.f32 %v2103_v15, %v359_v20  ;;  %v1483_v20 = vld [vmem:[%s2451_s4 + $0x40] sm:$0xff] }
  0x49   : > { %704 = vperm.xlu0 %1800, %v694_v30   ;;  %v1488_v30 = vld [vmem:[%s2451_s4 + $0x68] sm:$0xff] }
  0x4a   : > { %v361_v25 = vadd.f32 %v2112_v19, %v360_v22  ;;  %709 = vperm.xlu1 %1801, %v695_v31   ;;  %v1484_v22 = vld [vmem:[%s2451_s4 + $0x48] sm:$0xff] }
  0x4c   : > { %v362_v26 = vadd.f32 %v2115_v21, %v361_v25  ;;  %v1485_v25 = vld [vmem:[%s2451_s4 + $0x50] sm:$0xff] }
  0x4d   : > { %714 = vperm.xlu0 %1800, %v696_v34   ;;  %v1490_v34 = vld [vmem:[%s2451_s4 + $0x78] sm:$0xff] }
  0x4e   : > { %v363_v29 = vrot.slane %v362_v26, 4  ;;  %719 = vperm.xlu1 %1801, %v697_v35  }
  0x50   : > { %v364_v32 = vadd.f32 %v363_v29, %v362_v26  ;;  %v1486_v26 = vld [vmem:[%s2451_s4 + $0x58] sm:$0xff]  ;;  %v1487_v29 = vld [vmem:[%s2451_s4 + $0x60] sm:$0xff] }
  0x51   : > { %724 = vperm.xlu0 %1800, %v698_v39  }
  0x52   : > { %v365_v33 = vrot.slane %v364_v32, 2  ;;  %729 = vperm.xlu1 %1801, %v699_v40  }
  0x54   : > { %v366_v36 = vadd.f32 %v365_v33, %v364_v32  ;;  %v1489_v33 = vld [vmem:[%s2451_s4 + $0x70] sm:$0xff] }
  0x55   : > { %734 = vperm.xlu0 %1800, %v700_v46  }
  0x56   : > { %v367_v37 = vrot.slane %v366_v36, 1  ;;  %739 = vperm.xlu1 %1801, %v701_v47  }
  0x58   : > { %v368_v38 = vadd.f32 %v367_v37, %v366_v36 }
  0x59   : > { %829 = vperm.xlu0 %1800, %v1459_v55  }
  0x5a   : > { %v369_v41 = vmul.f32 0.015625, %v368_v38  ;;  %834 = vperm.xlu1 %1801, %v1460_v56  }
  0x5c   : > { %v2151_v42 = vsub.f32 %v2080_v3, %v369_v41  ;;  %v2154_v43 = vsub.f32 %v2082_v4, %v369_v41  ;;  %v2157_v44 = vsub.f32 %v2084_v5, %v369_v41  ;;  %v2160_v45 = vsub.f32 %v2089_v8, %v369_v41 }
  0x5d   : > { %v2169_v48 = vsub.f32 %v2094_v10, %v369_v41  ;;  %v2178_v52 = vsub.f32 %v2103_v15, %v369_v41  ;;  %v2189_v57 = vsub.f32 %v2112_v19, %v369_v41  ;;  %v377_v60 = vsub.f32 %v2115_v21, %v369_v41  ;;  %839 = vperm.xlu0 %1800, %v1461_v63  }
  0x5e   : > { %v378_v49 = vmul.f32 %v2151_v42, %v2151_v42  ;;  %v379_v50 = vmul.f32 %v2154_v43, %v2154_v43  ;;  %v380_v51 = vmul.f32 %v2157_v44, %v2157_v44  ;;  %v381_v53 = vmul.f32 %v2160_v45, %v2160_v45  ;;  %844 = vperm.xlu1 %1801, %v1462_v0  }
  0x5f   : > { %v382_v58 = vmul.f32 %v2169_v48, %v2169_v48  ;;  %v383_v61 = vmul.f32 %v2178_v52, %v2178_v52  ;;  %v384_v1 = vmul.f32 %v2189_v57, %v2189_v57  ;;  %v385_v6 = vmul.f32 %v377_v60, %v377_v60 }
  0x60   : > { %v386_v54 = vadd.f32 %v379_v50, %v378_v49 }
  0x61   : > { %849 = vperm.xlu0 %1800, %v1463_v9  }
  0x62   : > { %v387_v59 = vadd.f32 %v386_v54, %v380_v51  ;;  %854 = vperm.xlu1 %1801, %v1464_v11  }
  0x64   : > { %v388_v62 = vadd.f32 %v387_v59, %v381_v53 }
  0x65   : > { %859 = vperm.xlu0 %1800, %v1465_v14  }
  0x66   : > { %v389_v2 = vadd.f32 %v388_v62, %v382_v58  ;;  %864 = vperm.xlu1 %1801, %v1466_v16  }
  0x68   : > { %v390_v7 = vadd.f32 %v389_v2, %v383_v61 }
  0x69   : > { %1101 = vperm.xlu0 %1800, %v1483_v20  }
  0x6a   : > { %v391_v12 = vadd.f32 %v390_v7, %v384_v1  ;;  %1106 = vperm.xlu1 %1801, %v1484_v22  }
  0x6c   : > { %v392_v13 = vadd.f32 %v391_v12, %v385_v6 }
  0x6d   : > { %1111 = vperm.xlu0 %1800, %v1485_v25  }
  0x6e   : > { %v393_v17 = vrot.slane %v392_v13, 4  ;;  %1116 = vperm.xlu1 %1801, %v1486_v26  }
  0x70   : > { %v394_v18 = vadd.f32 %v393_v17, %v392_v13 }
  0x71   : > { %1121 = vperm.xlu0 %1800, %v1487_v29  }
  0x72   : > { %v395_v23 = vrot.slane %v394_v18, 2  ;;  %1126 = vperm.xlu1 %1801, %v1488_v30  }
  0x74   : > { %v396_v24 = vadd.f32 %v395_v23, %v394_v18 }
  0x75   : > { %1131 = vperm.xlu0 %1800, %v1489_v33   ;;  %v1807_v33 = vld [vmem:[#allocation2 + $0x8] sm:$0xff]  }
  0x76   : > { %v397_v27 = vrot.slane %v396_v24, 1  ;;  %1136 = vperm.xlu1 %1801, %v1490_v34   ;;  %v1808_v34 = vld [vmem:[#allocation2 + $0x10] sm:$0xff]  }
  0x78   : > { %v398_v28 = vadd.f32 %v397_v27, %v396_v24 }
  0x7a   : > { %v399_v31 = vmul.f32 0.015625, %v398_v28 }
  0x7c   : > { %v400_v32 = vmax.f32 %v399_v31, 0.0 }
  0x7e   : > { %v401_v35 = vadd.f32 1e-05, %v400_v32 }
  0x80   : > { %1818 = vrsqrt.f32 %v401_v35  ;;  %v1809_v35 = vld [vmem:[#allocation2 + $0x18] sm:$0xff]  }
  0x8a   : > { %v1819_v36 = vpop.eup %1818 }
  0x8b   : > { %v403_v37 = vmul.f32 %v1819_v36, %v2151_v42  ;;  %v404_v38 = vmul.f32 %v1819_v36, %v2154_v43  ;;  %v405_v39 = vmul.f32 %v1819_v36, %v2157_v44  ;;  %v406_v40 = vmul.f32 %v1819_v36, %v2160_v45  ;;  %v1803_v43 = vld [vmem:[%s2448_s1 + $0x8] sm:$0xff]   ;;  %v1804_v44 = vld [vmem:[%s2448_s1 + $0x10] sm:$0xff]   ;;  %v1805_v45 = vld [vmem:[%s2448_s1 + $0x18] sm:$0xff]  }
  0x8c   : > { %v407_v47 = vmul.f32 %v1819_v36, %v2169_v48  ;;  %v408_v49 = vmul.f32 %v1819_v36, %v2178_v52  ;;  %v409_v51 = vmul.f32 %v1819_v36, %v2189_v57  ;;  %v410_v53 = vmul.f32 %v1819_v36, %v377_v60  ;;  %v1806_v48 = vld [vmem:[#allocation2] sm:$0xff]  }
  0x8d   : > { %v419_v41 = vpack.c.bf16 %v404_v38, %v403_v37  ;;  %v420_v46 = vpack.c.bf16 %v406_v40, %v405_v39  ;;  %1598 = vmatprep.mubr.msk.bf16.mxu1 %vm491_vm0, %v1806_v48  ;;  %v1810_v36 = vld [vmem:[%s2448_s1 + $0x20] sm:$0xff]  }
  0x8e   : > { %v421_v50 = vpack.c.bf16 %v408_v49, %v407_v47  ;;  %v422_v42 = vpack.c.bf16 %v410_v53, %v409_v51 }
  0x8f   : > { %1574 = vmatprep.subr.bf16.mxu0 %v419_v41 }
  0x90   : > { %1575 = vmatpush3.bf16.msra.mxu0 %v419_v41 }
  0x91   : > { %1576 = vmatprep.subr.bf16.mxu0 %v420_v46 }
  0x94   : > { %1577 = vmatpush3.bf16.msra.mxu0 %v420_v46 }
  0x95   : > { %1578 = vmatprep.subr.bf16.mxu0 %v421_v50 }
  0x98   : > { %1579 = vmatpush3.bf16.msra.mxu0 %v421_v50 }
  0x99   : > { %1580 = vmatprep.subr.bf16.mxu0 %v422_v42 }
  0x9c   : > { %1581 = vmatpush3.bf16.msra.mxu0 %v422_v42 }
  0x9f   : > { %1583 = vmatmul.mubr.msk.bf16.vlgmr.msra.gmra.mrb[0].mxu0 %vm491_vm0, %v1803_v43 }
  0xa0   : > { %1586 = vmatprep.mubr.msk.bf16.mxu0 %vm491_vm0, %v1804_v44 }
  0xa7   : > { %1587 = vmatmul.mubr.msk.bf16.gmra.mrb[4].mxu0 %vm491_vm0, %v1805_v45 }
  0xa8   : > { %1614 = vmatprep.mubr.msk.bf16.mxu0 %vm491_vm0, %v1810_v36 }
  0xb8   : > { %v434_v52 = vpop.permute.xlu0 %433 }
  0xb9   : > { %v444_v54 = vpop.permute.xlu1 %443 }
  0xbc   : > { %v439_v55 = vpop.permute.xlu0 %438 }
  0xbd   : > { %v449_v56 = vpop.permute.xlu1 %448 }
  0xc0   : > { %v454_v60 = vpop.permute.xlu0 %453 }
  0xc1   : > { %v459_v1 = vpop.permute.xlu1 %458 }
  0xc4   : > { %v464_v13 = vpop.permute.xlu0 %463 }
  0xc5   : > { %v469_v20 = vpop.permute.xlu1 %468 }
  0xc8   : > { %v705_v37 = vpop.permute.xlu0 %704 }
  0xc9   : > { %v710_v38 = vpop.permute.xlu1 %709 }
  0xcc   : > { %v715_v47 = vpop.permute.xlu0 %714 }
  0xcd   : > { %v720_v53 = vpop.permute.xlu1 %719 }
 0x172   : > { %v1584_v57 = vpop.f32.mrb[0].mxu0 }
 0x173   : > { %v547_v58 = vadd.f32 %v1584_v57, %v444_v54  ;;  %v538_v59 = vpop.f32.mrb[1].mxu0  ;;  %v730_v57 = vpop.permute.xlu1 %729 }
 0x174   : > { %v539_v61 = vadd.f32 %v538_v59, %v434_v52  ;;  %v1585_v62 = vpop.f32.mrb[2].mxu0  ;;  %v725_v52 = vpop.permute.xlu0 %724 }
 0x175   : > { %v550_v63 = vadd.f32 %v1585_v62, %v449_v56  ;;  %v541_v0 = vpop.f32.mrb[3].mxu0  ;;  %v571_v6 = vmax.f32 %v547_v58, 0.0 }
 0x176   : > { %v542_v2 = vadd.f32 %v541_v0, %v439_v55  ;;  %v569_v9 = vmax.f32 %v539_v61, 0.0 }
 0x177   : > { %v572_v7 = vmax.f32 %v550_v63, 0.0 }
 0x178   : > { %v570_v11 = vmax.f32 %v542_v2, 0.0 }
 0x179   : > { %v586_v12 = vpack.c.bf16 %v572_v7, %v571_v6  ;;  %v740_v6 = vpop.permute.xlu1 %739 }
 0x17a   : > { %v1588_v14 = vpop.f32.mrb[4].mxu0  ;;  %v585_v16 = vpack.c.bf16 %v570_v11, %v569_v9 }
 0x17b   : > { %v563_v17 = vadd.f32 %v1588_v14, %v464_v13  ;;  %v554_v18 = vpop.f32.mrb[5].mxu0 }
 0x17c   : > { %v555_v22 = vadd.f32 %v554_v18, %v454_v60  ;;  %v1589_v23 = vpop.f32.mrb[6].mxu0  ;;  %1590 = vmatprep.subr.bf16.mxu1 %v585_v16 }
 0x17d   : > { %v566_v24 = vadd.f32 %v1589_v23, %v469_v20  ;;  %v557_v25 = vpop.f32.mrb[7].mxu0  ;;  %1591 = vmatpush3.bf16.msra.mxu1 %v585_v16  ;;  %v575_v27 = vmax.f32 %v563_v17, 0.0 }
 0x17e   : > { %v558_v26 = vadd.f32 %v557_v25, %v459_v1  ;;  %1592 = vmatprep.subr.bf16.mxu1 %v586_v12  ;;  %v573_v29 = vmax.f32 %v555_v22, 0.0  ;;  %v735_v1 = vpop.permute.xlu0 %734 }
 0x17f   : > { %v576_v28 = vmax.f32 %v566_v24, 0.0 }
 0x180   : > { %v574_v30 = vmax.f32 %v558_v26, 0.0 }
 0x181   : > { %v588_v31 = vpack.c.bf16 %v576_v28, %v575_v27  ;;  %1593 = vmatpush3.bf16.msra.mxu1 %v586_v12 }
 0x182   : > { %v587_v32 = vpack.c.bf16 %v574_v30, %v573_v29 }
 0x184   : > { %1594 = vmatprep.subr.bf16.mxu1 %v587_v32 }
 0x185   : > { %1595 = vmatpush3.bf16.msra.mxu1 %v587_v32 }
 0x186   : > { %1596 = vmatprep.subr.bf16.mxu1 %v588_v31 }
 0x189   : > { %1597 = vmatpush3.bf16.msra.mxu1 %v588_v31 }
 0x18c   : > { %1599 = vmatmul.mubr.msk.bf16.vlgmr.msra.gmra.mrb[0].mxu1 %vm491_vm0, %v1807_v33 }
 0x18d   : > { %1602 = vmatprep.mubr.msk.bf16.mxu1 %vm491_vm0, %v1808_v34 }
 0x194   : > { %1603 = vmatmul.mubr.msk.bf16.gmra.mrb[4].mxu1 %vm491_vm0, %v1809_v35 }
 0x25f   : > { %v1600_v39 = vpop.f32.mrb[0].mxu1 }
 0x260   : > { %v655_v40 = vpop.f32.mrb[1].mxu1  ;;  %v688_v50 = vadd.f32 %v1600_v39, %v2084_v5 }
 0x261   : > { %v686_v41 = vadd.f32 %v2080_v3, %v655_v40  ;;  %v1601_v46 = vpop.f32.mrb[2].mxu1 }
 0x262   : > { %v658_v49 = vpop.f32.mrb[3].mxu1  ;;  %v689_v43 = vadd.f32 %v1601_v46, %v2089_v8  ;;  %v2275_v45 = vadd.f32 %v715_v47, %v688_v50 }
 0x263   : > { %v687_v51 = vadd.f32 %v2082_v4, %v658_v49  ;;  %v2270_v42 = vadd.f32 %v705_v37, %v686_v41 }
 0x264   : > { %v2279_v55 = vadd.f32 %v720_v53, %v689_v43 }
 0x265   : > { %v2273_v44 = vadd.f32 %v710_v38, %v687_v51 }
 0x267   : > { %v750_v48 = vadd.f32 %v2273_v44, %v2270_v42  ;;  %v1604_v3 = vpop.f32.mrb[4].mxu1 }
 0x268   : > { %v671_v54 = vpop.f32.mrb[5].mxu1  ;;  %v692_v8 = vadd.f32 %v1604_v3, %v2112_v19 }
 0x269   : > { %v751_v5 = vadd.f32 %v750_v48, %v2275_v45  ;;  %v690_v4 = vadd.f32 %v2094_v10, %v671_v54  ;;  %v1605_v56 = vpop.f32.mrb[6].mxu1 }
 0x26a   : > { %v674_v58 = vpop.f32.mrb[7].mxu1  ;;  %v693_v63 = vadd.f32 %v1605_v56, %v2115_v21  ;;  %v2292_v2 = vadd.f32 %v735_v1, %v692_v8 }
 0x26b   : > { %v2284_v59 = vadd.f32 %v725_v52, %v690_v4  ;;  %v752_v60 = vadd.f32 %v751_v5, %v2279_v55  ;;  %v691_v61 = vadd.f32 %v2103_v15, %v674_v58 }
 0x26c   : > { %v2295_v7 = vadd.f32 %v740_v6, %v693_v63  ;;  %v1812_v6 = vld [vmem:[%s2448_s1 + $0x30] sm:$0xff]  }
 0x26d   : > { %v753_v62 = vadd.f32 %v752_v60, %v2284_v59  ;;  %v2290_v0 = vadd.f32 %v730_v57, %v691_v61 }
 0x26f   : > { %v754_v10 = vadd.f32 %v753_v62, %v2290_v0 }
 0x271   : > { %v755_v19 = vadd.f32 %v754_v10, %v2292_v2  ;;  %v1811_v10 = vld [vmem:[%s2448_s1 + $0x28] sm:$0xff]  }
 0x273   : > { %v756_v9 = vadd.f32 %v755_v19, %v2295_v7  ;;  %v1813_v19 = vld [vmem:[%s2448_s1 + $0x38] sm:$0xff]  }
 0x275   : > { %v757_v11 = vrot.slane %v756_v9, 4 }
 0x277   : > { %v758_v15 = vadd.f32 %v757_v11, %v756_v9  ;;  %v1814_v9 = vld [vmem:[#allocation2 + $0x20] sm:$0xff]   ;;  %v830_v11 = vpop.permute.xlu0 %829 }
 0x278   : > { %1630 = vmatprep.mubr.msk.bf16.mxu1 %vm491_vm0, %v1814_v9 }
 0x279   : > { %v759_v12 = vrot.slane %v758_v15, 2 }
 0x27b   : > { %v760_v13 = vadd.f32 %v759_v12, %v758_v15  ;;  %v835_v15 = vpop.permute.xlu1 %834  ;;  %v840_v12 = vpop.permute.xlu0 %839 }
 0x27d   : > { %v761_v14 = vrot.slane %v760_v13, 1 }
 0x27f   : > { %v762_v21 = vadd.f32 %v761_v14, %v760_v13  ;;  %v845_v13 = vpop.permute.xlu1 %844 }
 0x281   : > { %v763_v16 = vmul.f32 0.015625, %v762_v21 }
 0x283   : > { %v764_v17 = vsub.f32 %v2270_v42, %v763_v16  ;;  %v765_v18 = vsub.f32 %v2273_v44, %v763_v16  ;;  %v766_v20 = vsub.f32 %v2275_v45, %v763_v16  ;;  %v767_v22 = vsub.f32 %v2279_v55, %v763_v16 }
 0x284   : > { %v768_v25 = vsub.f32 %v2284_v59, %v763_v16  ;;  %v769_v28 = vsub.f32 %v2290_v0, %v763_v16  ;;  %v770_v31 = vsub.f32 %v2292_v2, %v763_v16  ;;  %v771_v35 = vsub.f32 %v2295_v7, %v763_v16 }
 0x285   : > { %v772_v23 = vmul.f32 %v764_v17, %v764_v17  ;;  %v773_v24 = vmul.f32 %v765_v18, %v765_v18  ;;  %v774_v26 = vmul.f32 %v766_v20, %v766_v20  ;;  %v775_v29 = vmul.f32 %v767_v22, %v767_v22 }
 0x286   : > { %v776_v32 = vmul.f32 %v768_v25, %v768_v25  ;;  %v777_v34 = vmul.f32 %v769_v28, %v769_v28  ;;  %v778_v37 = vmul.f32 %v770_v31, %v770_v31  ;;  %v779_v39 = vmul.f32 %v771_v35, %v771_v35 }
 0x287   : > { %v780_v27 = vadd.f32 %v773_v24, %v772_v23  ;;  %v855_v24 = vpop.permute.xlu1 %854 }
 0x289   : > { %v781_v30 = vadd.f32 %v780_v27, %v774_v26 }
 0x28b   : > { %v782_v33 = vadd.f32 %v781_v30, %v775_v29 }
 0x28d   : > { %v783_v36 = vadd.f32 %v782_v33, %v776_v32 }
 0x28f   : > { %v784_v38 = vadd.f32 %v783_v36, %v777_v34  ;;  %v865_v36 = vpop.permute.xlu1 %864 }
 0x291   : > { %v785_v40 = vadd.f32 %v784_v38, %v778_v37 }
 0x293   : > { %v786_v41 = vadd.f32 %v785_v40, %v779_v39 }
 0x295   : > { %v787_v46 = vrot.slane %v786_v41, 4 }
 0x297   : > { %v788_v47 = vadd.f32 %v787_v46, %v786_v41 }
 0x299   : > { %v789_v49 = vrot.slane %v788_v47, 2 }
 0x29b   : > { %v790_v50 = vadd.f32 %v789_v49, %v788_v47 }
 0x29d   : > { %v791_v51 = vrot.slane %v790_v50, 1 }
 0x29f   : > { %v792_v53 = vadd.f32 %v791_v51, %v790_v50 }
 0x2a1   : > { %v793_v43 = vmul.f32 0.015625, %v792_v53 }
 0x2a3   : > { %v794_v48 = vmax.f32 %v793_v43, 0.0  ;;  %v1815_v43 = vld [vmem:[#allocation2 + $0x28] sm:$0xff]  }
 0x2a5   : > { %v795_v3 = vadd.f32 1e-05, %v794_v48  ;;  %v1816_v48 = vld [vmem:[#allocation2 + $0x30] sm:$0xff]  }
 0x2a7   : > { %1820 = vrsqrt.f32 %v795_v3  ;;  %v1817_v3 = vld [vmem:[#allocation2 + $0x38] sm:$0xff]  }
 0x2b1   : > { %v1821_v52 = vpop.eup %1820 }
 0x2b2   : > { %v797_v54 = vmul.f32 %v1821_v52, %v764_v17  ;;  %v798_v5 = vmul.f32 %v1821_v52, %v765_v18  ;;  %v799_v4 = vmul.f32 %v1821_v52, %v766_v20  ;;  %v800_v56 = vmul.f32 %v1821_v52, %v767_v22  ;;  %v850_v17 = vpop.permute.xlu0 %849 }
 0x2b3   : > { %v801_v8 = vmul.f32 %v1821_v52, %v768_v25  ;;  %v802_v60 = vmul.f32 %v1821_v52, %v769_v28  ;;  %v803_v62 = vmul.f32 %v1821_v52, %v770_v31  ;;  %v804_v63 = vmul.f32 %v1821_v52, %v771_v35 }
 0x2b4   : > { %v814_v57 = vpack.c.bf16 %v798_v5, %v797_v54  ;;  %v815_v58 = vpack.c.bf16 %v800_v56, %v799_v4  ;;  %v1938_v52 = vmov 0.0|0.0   ;;  %v1940_v54 = vmov 0.0   ;;  %v1221_v5 = vld [vmem:[%s2453_s6] sm:$0xff]  ;;  %v1222_v4 = vld [vmem:[%s2453_s6 + $0x8] sm:$0xff]  ;;  %v1223_v56 = vld [vmem:[%s2453_s6 + $0x10] sm:$0xff] }
 0x2b5   : > { %v816_v61 = vpack.c.bf16 %v802_v60, %v801_v8  ;;  %v817_v1 = vpack.c.bf16 %v804_v63, %v803_v62  ;;  %v1225_v60 = vld [vmem:[%s2453_s6 + $0x20] sm:$0xff]  ;;  %v1227_v63 = vld [vmem:[%s2453_s6 + $0x30] sm:$0xff] }
 0x2b6   : > { %1606 = vmatprep.subr.bf16.mxu0 %v814_v57  ;;  %v860_v31 = vpop.permute.xlu0 %859 }
 0x2b7   : > { %1607 = vmatpush3.bf16.msra.mxu0 %v814_v57  ;;  %v1705_v57 = vpack.c.bf16 %v1222_v4, %v1221_v5 }
 0x2b8   : > { %1608 = vmatprep.subr.bf16.mxu0 %v815_v58 }
 0x2bb   : > { %1609 = vmatpush3.bf16.msra.mxu0 %v815_v58  ;;  %v1224_v58 = vld [vmem:[%s2453_s6 + $0x18] sm:$0xff] }
 0x2bc   : > { %1610 = vmatprep.subr.bf16.mxu0 %v816_v61  ;;  %v1708_v8 = vpack.c.bf16 %v1224_v58, %v1223_v56 }
 0x2bf   : > { %1611 = vmatpush3.bf16.msra.mxu0 %v816_v61  ;;  %v1226_v61 = vld [vmem:[%s2453_s6 + $0x28] sm:$0xff] }
 0x2c0   : > { %1612 = vmatprep.subr.bf16.mxu0 %v817_v1  ;;  %v1711_v62 = vpack.c.bf16 %v1226_v61, %v1225_v60 }
 0x2c3   : > { %1613 = vmatpush3.bf16.msra.mxu0 %v817_v1  ;;  %v1228_v1 = vld [vmem:[%s2453_s6 + $0x38] sm:$0xff] }
 0x2c4   : > { %1692 = vmatprep.subr.bf16.mxu0 %v1938_v52 }
 0x2c6   : > { %1615 = vmatmul.mubr.msk.bf16.vlgmr.msra.gmra.mrb[8].mxu0 %vm491_vm0, %v1811_v10  ;;  %v1714_v10 = vpack.c.bf16 %v1228_v1, %v1227_v63 }
 0x2c7   : > { %1618 = vmatprep.mubr.msk.bf16.mxu0 %vm491_vm0, %v1812_v6  ;;  %v1229_v6 = vld [vmem:[%s2453_s6 + $0x40] sm:$0xff] }
 0x2ce   : > { %1619 = vmatmul.mubr.msk.bf16.gmra.mrb[12].mxu0 %vm491_vm0, %v1813_v19  ;;  %v1230_v19 = vld [vmem:[%s2453_s6 + $0x48] sm:$0xff] }
 0x2cf   : > { %1654 = vmatprep.mubr.msk.f32.mxu0 %vm1939_vm1, %v1940_v54  ;;  %v1717_v9 = vpack.c.bf16 %v1230_v19, %v1229_v6 }
 0x399   : > { %v1616_v14 = vpop.f32.mrb[8].mxu0 }
 0x39a   : > { %v942_v21 = vadd.f32 %v1616_v14, %v840_v12  ;;  %v933_v16 = vpop.f32.mrb[9].mxu0  ;;  %v1234_v14 = vld [vmem:[%s2453_s6 + $0x68] sm:$0xff] }
 0x39b   : > { %v934_v18 = vadd.f32 %v933_v16, %v830_v11  ;;  %v1617_v20 = vpop.f32.mrb[10].mxu0  ;;  %v1231_v11 = vld [vmem:[%s2453_s6 + $0x50] sm:$0xff] }
 0x39c   : > { %v945_v22 = vadd.f32 %v1617_v20, %v845_v13  ;;  %v936_v23 = vpop.f32.mrb[11].mxu0  ;;  %v966_v26 = vmax.f32 %v942_v21, 0.0  ;;  %v1233_v13 = vld [vmem:[%s2453_s6 + $0x60] sm:$0xff]  ;;  %v1235_v16 = vld [vmem:[%s2453_s6 + $0x70] sm:$0xff]  ;;  %v1102_v20 = vpop.permute.xlu0 %1101 }
 0x39d   : > { %v937_v25 = vadd.f32 %v936_v23, %v835_v15  ;;  %v964_v28 = vmax.f32 %v934_v18, 0.0  ;;  %v1232_v15 = vld [vmem:[%s2453_s6 + $0x58] sm:$0xff]  ;;  %v1723_v21 = vpack.c.bf16 %v1234_v14, %v1233_v13 }
 0x39e   : > { %v967_v27 = vmax.f32 %v945_v22, 0.0  ;;  %v1720_v12 = vpack.c.bf16 %v1232_v15, %v1231_v11  ;;  %v1107_v22 = vpop.permute.xlu1 %1106 }
 0x39f   : > { %v965_v29 = vmax.f32 %v937_v25, 0.0 }
 0x3a0   : > { %v982_v30 = vpack.c.bf16 %v967_v27, %v966_v26  ;;  %v1112_v23 = vpop.permute.xlu0 %1111 }
 0x3a1   : > { %v981_v32 = vpack.c.bf16 %v965_v29, %v964_v28  ;;  %v1620_v33 = vpop.f32.mrb[12].mxu0 }
 0x3a2   : > { %v958_v34 = vadd.f32 %v1620_v33, %v860_v31  ;;  %v949_v35 = vpop.f32.mrb[13].mxu0 }
 0x3a3   : > { %v950_v37 = vadd.f32 %v949_v35, %v850_v17  ;;  %v1621_v38 = vpop.f32.mrb[14].mxu0  ;;  %1622 = vmatprep.subr.bf16.mxu1 %v981_v32  ;;  %v1236_v17 = vld [vmem:[%s2453_s6 + $0x78] sm:$0xff] }
 0x3a4   : > { %v961_v39 = vadd.f32 %v1621_v38, %v865_v36  ;;  %v952_v40 = vpop.f32.mrb[15].mxu0  ;;  %1623 = vmatpush3.bf16.msra.mxu1 %v981_v32  ;;  %v970_v46 = vmax.f32 %v958_v34, 0.0  ;;  %v1726_v18 = vpack.c.bf16 %v1236_v17, %v1235_v16  ;;  %v1122_v35 = vpop.permute.xlu0 %1121 }
 0x3a5   : > { %v953_v41 = vadd.f32 %v952_v40, %v855_v24  ;;  %1624 = vmatprep.subr.bf16.mxu1 %v982_v30  ;;  %v968_v49 = vmax.f32 %v950_v37, 0.0  ;;  %v1117_v24 = vpop.permute.xlu1 %1116 }
 0x3a6   : > { %v971_v47 = vmax.f32 %v961_v39, 0.0 }
 0x3a7   : > { %v969_v50 = vmax.f32 %v953_v41, 0.0 }
 0x3a8   : > { %v984_v51 = vpack.c.bf16 %v971_v47, %v970_v46  ;;  %1625 = vmatpush3.bf16.msra.mxu1 %v982_v30 }
 0x3a9   : > { %v983_v53 = vpack.c.bf16 %v969_v50, %v968_v49  ;;  %v1127_v36 = vpop.permute.xlu1 %1126 }
 0x3ab   : > { %1626 = vmatprep.subr.bf16.mxu1 %v983_v53 }
 0x3ac   : > { %1627 = vmatpush3.bf16.msra.mxu1 %v983_v53 }
 0x3ad   : > { %1628 = vmatprep.subr.bf16.mxu1 %v984_v51  ;;  %v1137_v50 = vpop.permute.xlu1 %1136 }
 0x3b0   : > { %1629 = vmatpush3.bf16.msra.mxu1 %v984_v51 }
 0x3b1   : > { %1704 = vmatprep.subr.bf16.mxu1 %v1938_v52 }
 0x3b3   : > { %1631 = vmatmul.mubr.msk.bf16.vlgmr.msra.gmra.mrb[8].mxu1 %vm491_vm0, %v1815_v43 }
 0x3b4   : > { %1634 = vmatprep.mubr.msk.bf16.mxu1 %vm491_vm0, %v1816_v48  ;;  %1706 = vmatpush3.bf16.msra.mxu1 %v1705_v57 }
 0x3b5   : > { %1707 = vmatprep.subr.bf16.mxu1 %v1938_v52 }
 0x3b8   : > { %1709 = vmatpush3.bf16.msra.mxu1 %v1708_v8 }
 0x3b9   : > { %1710 = vmatprep.subr.bf16.mxu1 %v1938_v52 }
 0x3bb   : > { %1635 = vmatmul.mubr.msk.bf16.gmra.mrb[12].mxu1 %vm491_vm0, %v1817_v3 }
 0x3bc   : > { %1689 = vmatprep.mubr.msk.f32.mxu1 %vm1939_vm1, %v1940_v54  ;;  %1712 = vmatpush3.bf16.msra.mxu1 %v1711_v62 }
 0x3bd   : > { %1713 = vmatprep.subr.bf16.mxu1 %v1938_v52 }
 0x3c0   : > { %1715 = vmatpush3.bf16.msra.mxu1 %v1714_v10 }
 0x3c1   : > { %1716 = vmatprep.subr.bf16.mxu1 %v1938_v52 }
 0x3c4   : > { %1718 = vmatpush3.bf16.msra.mxu1 %v1717_v9 }
 0x3c5   : > { %1719 = vmatprep.subr.bf16.mxu1 %v1938_v52 }
 0x3c8   : > { %1721 = vmatpush3.bf16.msra.mxu1 %v1720_v12 }
 0x3c9   : > { %1722 = vmatprep.subr.bf16.mxu1 %v1938_v52 }
 0x3cc   : > { %1724 = vmatpush3.bf16.msra.mxu1 %v1723_v21 }
 0x3cd   : > { %1725 = vmatprep.subr.bf16.mxu1 %v1938_v52 }
 0x3d0   : > { %1727 = vmatpush3.bf16.msra.mxu1 %v1726_v18 }
 0x486   : > { %v1632_v25 = vpop.f32.mrb[8].mxu1 }
 0x487   : > { %v1084_v26 = vadd.f32 %v1632_v25, %v2275_v45  ;;  %v1051_v27 = vpop.f32.mrb[9].mxu1 }
 0x488   : > { %v1082_v28 = vadd.f32 %v1051_v27, %v2270_v42  ;;  %v1633_v29 = vpop.f32.mrb[10].mxu1 }
 0x489   : > { %v1085_v30 = vadd.f32 %v1633_v29, %v2279_v55  ;;  %v1054_v31 = vpop.f32.mrb[11].mxu1  ;;  %v1141_v33 = vadd.f32 %v1112_v23, %v1084_v26 }
 0x48a   : > { %v1083_v32 = vadd.f32 %v1054_v31, %v2273_v44  ;;  %v1139_v37 = vadd.f32 %v1102_v20, %v1082_v28  ;;  %v1132_v44 = vpop.permute.xlu0 %1131 }
 0x48b   : > { %v1142_v34 = vadd.f32 %v1117_v24, %v1085_v30 }
 0x48c   : > { %v1140_v38 = vadd.f32 %v1107_v22, %v1083_v32 }
 0x48d   : > { %v1696_v39 = vpack.c.bf16 %v1142_v34, %v1141_v33 }
 0x48e   : > { %v1693_v40 = vpack.c.bf16 %v1140_v38, %v1139_v37  ;;  %v1636_v41 = vpop.f32.mrb[12].mxu1 }
 0x48f   : > { %v1088_v45 = vadd.f32 %v1636_v41, %v2292_v2  ;;  %v1067_v46 = vpop.f32.mrb[13].mxu1 }
 0x490   : > { %v1086_v42 = vadd.f32 %v1067_v46, %v2284_v59  ;;  %v1637_v47 = vpop.f32.mrb[14].mxu1  ;;  %1694 = vmatpush3.bf16.msra.mxu0 %v1693_v40 }
 0x491   : > { %v1089_v55 = vadd.f32 %v1637_v47, %v2295_v7  ;;  %v1070_v49 = vpop.f32.mrb[15].mxu1  ;;  %1695 = vmatprep.subr.bf16.mxu0 %v1938_v52  ;;  %v1145_v53 = vadd.f32 %v1132_v44, %v1088_v45  ;;  %v1147_v7 = vld [vmem:[%s2452_s5] sm:$0xf] }
 0x492   : > { %v1087_v51 = vadd.f32 %v1070_v49, %v2290_v0  ;;  %v1143_v48 = vadd.f32 %v1122_v35, %v1086_v42 }
 0x493   : > { %v1146_v43 = vadd.f32 %v1137_v50, %v1089_v55 }
 0x494   : > { %v1144_v3 = vadd.f32 %v1127_v36, %v1087_v51  ;;  %1697 = vmatpush3.bf16.msra.mxu0 %v1696_v39 }
 0x495   : > { %v1702_v2 = vpack.c.bf16 %v1146_v43, %v1145_v53  ;;  %1698 = vmatprep.subr.bf16.mxu0 %v1938_v52 }
 0x496   : > { %v1699_v59 = vpack.c.bf16 %v1144_v3, %v1143_v48 }
 0x498   : > { %1700 = vmatpush3.bf16.msra.mxu0 %v1699_v59 }
 0x499   : > { %1701 = vmatprep.subr.bf16.mxu0 %v1938_v52 }
 0x49c   : > { %1703 = vmatpush3.bf16.msra.mxu0 %v1702_v2 }
 0x49f   : > { %1655 = vmatmul.mubr.msk.f32.vlgmr.msra.gmra.mrb[16].mxu0 %vm491_vm0, %v1147_v7 }
 0x572   : > { %v1217_v0 = vpop.f32.mrb[16].mxu0 }
 0x573   : > { %v1656_v54 = vpop.f32.mrb[17].mxu0  ;;  %1690 = vmatmul.mubr.f32.vlgmr.msra.gmra.mrb[16].mxu1 %v1217_v0 }
 0x646   : > { %v1303_v52 = vpop.f32.mrb[16].mxu1 }
 0x647   : > { %1307 = vst [vmem:[%s324_s18] sm:$0xf] %v1303_v52  ;;  %v1691_v5 = vpop.f32.mrb[17].mxu1 }
 0x648   : > { %1863 = shalt.err (!%p1860_p6)
}
 0x649   : > { %s1864_s22 = scalar_lea.hbm %s2402_s17, 64  ;;  %s1868_s18 = scalar_lea.hbm %s2454_s7, 128 }
 0x64a   : > { %p1865_p7 = scmp.ne.s32.totalorder %s2402_s17, %s1864_s22  ;;  %p1869_p0 = scmp.lt.u32.totalorder %s2402_s17, %s2454_s7 }
 0x64b   : > { %p1870_p2 = scmp.lt.u32.totalorder %s1868_s18, %s1864_s22  ;;  %p1872_p8 = scmp.lt.u32.totalorder %s1864_s22, %s2402_s17 }
 0x64c   : > { %p1866_p9 = pnand %p1865_p7, %p2466_p10 }
 0x64d   : > { %p1871_p4 = por %p1870_p2, %p1869_p0 }
 0x64e   : > { %p1867_p12 = pneg %p1866_p9 }
 0x64f   : > { %p1873_p11 = por %p1872_p8, %p1871_p4 }
 0x651   : > { %p1874_p13 = pnand %p1873_p11, %p1867_p12 }
 0x653   : > { %1877 = shalt.err (!%p1874_p13)
}
 0x654   : > { %1732 = dma.vmem_to_hbm [thread:$0]  (%p2466_p10), %s2397_s15, 64, %s2402_s17, %s1309_s20  }
 0x655 PF: > { %p1744_p1 = scmp.ge.s32.totalorder %s1932_s29, 2  ;;  %s1335_s12 = sand.u32 1, %s1912_s24  }
 0x656   : > { %p2467_p3 = scmp.ne.s32.totalorder %s2460_s13, 0  ;;  %s1336_s21 = scalar_lea.sflag [#allocation4], %s1335_s12 }
 0x658   : > { %p1739_p5 = pnand %p1744_p1, %p2467_p3 }
 0x65a   : > { %1907 = dma.done.wait (!%p1739_p5), %s1336_s21, 64  }
 0x65b   : > { %1909 = vsyncadd (!%p1739_p5), %s1336_s21, 4294967232  ;;  %s21_s29 = sadd.s32 1, %s1932_s29   ;;  %s2468_s24 = smov %s1916_s25 }
 0x65c   : > { %p18_p6 = scmp.ge.s32.totalorder %s21_s29, 4   ;;  %s2469_s25 = smov %s1920_s26 }
 0x65d   : > { %s2470_s26 = smov %s2035_s14  ;;  %s2471_s27 = smov %s1928_s28 }
 0x65e   : > { %s2472_s28 = smov %s2474_s9  ;;  %20 = sbr.rel (!%p18_p6) target bundleno = 5 (0x5), region = 95 }
 0x665   :  { %1341 = vsyncpa [#allocation3], 1 }
 0x666   :  { %1343 = vsyncpa [#allocation3 + $0x1], 1 }
 0x667   :  { %1344 = vsyncpa [#allocation4], 1 }
 0x668   :  { %1346 = vsyncpa [#allocation4 + $0x1], 1 }

// kernel: tpu_custom_call.1
= control target key start
LH: loop header
LB: loop body
LE: loop exit
PB: predicated region body
PF: predicated region fallthrough
CT: control target
= control target key end

     0   :  { %12 = vsyncpa [#allocation3], 0  ;;  %s2447_s0 = inlined_call_operand.vmem [shape: bf16[2,64,128], index: 0, kind: input, shape index: {}]   ;;  %s2448_s1 = inlined_call_operand.vmem [shape: bf16[2,64,64], index: 1, kind: input, shape index: {}]   ;;  %s2449_s2 = inlined_call_operand.vmem [shape: f32[2,64,1], index: 2, kind: input, shape index: {}]   ;;  %s2450_s3 = inlined_call_operand.hbm [shape: bf16[2,64,64], index: 3, kind: input, shape index: {}]   ;;  %s2451_s4 = inlined_call_operand.vmem [shape: f32[2,64,1], index: 4, kind: input, shape index: {}]   ;;  %s2452_s5 = inlined_call_operand.vmem [shape: f32[4,64], index: 5, kind: input, shape index: {}]   ;;  %s2453_s6 = inlined_call_operand.vmem [shape: f32[128,128], index: 6, kind: input, shape index: {}]   ;;  %s2454_s7 = inlined_call_operand.hbm [shape: f32[2,1,4,128], index: 7, kind: output, shape index: {}]  }
   0x1   :  { %13 = vsyncpa [#allocation4], 0 }
   0x2   :  { %15 = vsyncpa [#allocation4 + $0x1], 0  ;;  %s1982_s24 = smov 0   ;;  %s1984_s25 = smov 0  }
   0x3   :  { %s1986_s26 = smov 0   ;;  %s1988_s27 = smov 0  }
   0x4   :  { %s1990_s28 = smov 0   ;;  %s1992_s29 = smov 0  }
   0x5 LB: > { %s1424_s30 = sadd.s32 4294967295, %s1932_s29   ;;  %s1425_s8 = sadd.s32 4294967294, %s1932_s29   ;;  %s1932_s29 = sphi %s1992_s29, %s21_s29   ;;  %s1928_s28 = sphi %s1990_s28, %s2472_s28   ;;  %s1924_s27 = sphi %s1988_s27, %s2471_s27   ;;  %s1920_s26 = sphi %s1986_s26, %s2470_s26   ;;  %s1916_s25 = sphi %s1984_s25, %s2469_s25   ;;  %s1912_s24 = sphi %s1982_s24, %s2468_s24  }
   0x6   : > { %s33_s9 = sadd.s32 1, %s1928_s28  ;;  %s201_s10 = sadd.s32 1, %s1920_s26 }
   0x7   : > { %p35_p0 = scmp.ge.s32.totalorder %s33_s9, 2  ;;  %p211_p1 = scmp.ne.s32.totalorder %s1920_s26, %s1916_s25 }
   0x8   : > { %p212_p2 = scmp.eq.s32.totalorder %s1424_s30, 1  ;;  %p217_p3 = scmp.ne.s32.totalorder %s1916_s25, %s1912_s24 }
   0x9   : > { %s2474_s9 = smov (%p35_p0, %s33_s9), 0  ;;  %p218_p5 = scmp.eq.s32.totalorder %s1425_s8, 1 }
   0xa   : > { %p2022_p4 = por %p212_p2, %p211_p1  ;;  %s196_s12 = ssub.s32 %s1928_s28, %s2474_s9 }
   0xb   : > { %p1426_p6 = scmp.ge.s32.totalorder %s1932_s29, 1  ;;  %p199_p7 = scmp.eq.s32.totalorder %s196_s12, 0 }
   0xc   : > { %s2459_s11 = scalar_select %p2022_p4, 1, 0 }
   0xd   : > { %p2029_p8 = por %p218_p5, %p217_p3  ;;  %p225_p9 = scmp.lt.s32.totalorder %s1932_s29, 3 }
   0xe   : > { %s2035_s14 = scalar_select %p199_p7, %s1920_s26, %s201_s10  }
   0xf   : > { %s2460_s13 = scalar_select %p2029_p8, 1, 0 }
  0x10   : > { %p2037_p10 = pnand %p1426_p6, %p225_p9  ;;  %p2041_p11 = scmp.eq.s32.totalorder %s1424_s30, 0 }
  0x11   : > { %s1934_s17 = smov [#allocation2]   ;;  %s1822_s22 = scalar_lea.hbm %s2450_s3, 1024 }
  0x12   : > { %s2461_s15 = scalar_select %p2037_p10, 1, 0 }
  0x13   : > { %s2462_s16 = scalar_select %p2041_p11, 1, 0 }
  0x14   : > { %p1734_p12 = pneg %p2037_p10  ;;  %s243_s18 = sshll.u32 %s1934_s17, 4  ;;  %s244_s18 = int_to_ptr.vmem [resolvable:$true] %s243_s18 }
  0x15   : > { %p1823_p0 = scmp.ne.s32.totalorder %s2450_s3, %s1822_s22  ;;  %p1829_p5 = scmp.lt.u32.totalorder %s1822_s22, %s2450_s3 }
  0x16   : > { %p2049_p13 = pnand %p2041_p11, %p1734_p12 }
  0x18   : > { %p1824_p1 = pneg %p2049_p13 }
  0x1a   : > { %p1825_p2 = pnand %p1824_p1, %p1823_p0 }
  0x1c   : > { %p1826_p3 = pneg %p1825_p2 }
  0x1e   : > { %p1831_p6 = pnand %p1829_p5, %p1826_p3 }
  0x20   : > { %1834 = shalt.err (!%p1831_p6)
}
  0x21   : > { %s1835_s12 = scalar_lea.vmem %s244_s18, 1024  ;;  %p1843_p8 = scmp.lt.s32.totalorder %s244_s18, %s244_s18 }
  0x22   : > { %p1836_p7 = scmp.ne.s32.totalorder %s244_s18, %s1835_s12  ;;  %p1844_p4 = scmp.lt.s32.totalorder %s1835_s12, %s1835_s12 }
  0x24   : > { %p1838_p9 = pnand %p1836_p7, %p1824_p1  ;;  %p1845_p11 = por %p1844_p4, %p1843_p8 }
  0x26   : > { %p1839_p12 = pneg %p1838_p9 }
  0x28   : > { %p1846_p10 = pnand %p1845_p11, %p1839_p12 }
  0x2a   : > { %1849 = shalt.err (!%p1846_p10)
}
  0x2b   : > { %s1935_s17 = smov 64   ;;  %s1936_s20 = smov 4  }
  0x2c   : > { %1737 = dma.hbm_to_vmem [thread:$0]  (!%p2049_p13), %s2450_s3, 1024, %s244_s18, [#allocation3], %s1935_s17, %s1935_s17, %s1936_s20  }
  0x2d   : > { %p2464_p0 = scmp.ne.s32.totalorder %s2461_s15, 0 }
  0x2e   : > { %p2465_p2 = scmp.ne.s32.totalorder (!%p2464_p0), %s2462_s16, 0 }
  0x2f   : > { %285 = sbr.rel (%p2464_p0) target bundleno = 1621 (0x655), region = 48 }
  0x36   : > { %1903 = dma.done.wait (%p2465_p2), [#allocation3], 1024  }
  0x37   : > { %1905 = vsyncadd (%p2465_p2), [#allocation3], 4294966272  ;;  %p325_p4 = scmp.lt.s32.totalorder %s1924_s27, 1  ;;  %v1937_v0 = vmov 0   ;;  %vm491_vm0 = vcmask 523264   ;;  %v1802_v7 = vld [vmem:[%s2448_s1] sm:$0xff]  }
  0x38   : > { %1800 = vset.pattern.permute.xlu0 %v1937_v0  ;;  %1801 = vset.pattern.permute.xlu1 %v1937_v0  ;;  %v423_v12 = vld [vmem:[%s2449_s2] sm:$0xff]  ;;  %v425_v13 = vld [vmem:[%s2449_s2 + $0x10] sm:$0xff]  ;;  %v424_v17 = vld [vmem:[%s2449_s2 + $0x8] sm:$0xff]  ;;  %vm1939_vm1 = vmmov 0   ;;  %s322_s30 = sand.u32 1, %s1916_s25   ;;  %s1493_s16 = sshll.u32 %s1924_s27, 6 }
  0x39   : > { %s326_s19 = scalar_select %p325_p4, %s1924_s27, 1  ;;  %1582 = vmatprep.mubr.msk.bf16.mxu0 %vm491_vm0, %v1802_v7  ;;  %433 = vperm.xlu0 %1800, %v423_v12   ;;  %v426_v18 = vld [vmem:[%s2449_s2 + $0x18] sm:$0xff]  ;;  %v427_v23 = vld [vmem:[%s2449_s2 + $0x20] sm:$0xff]  ;;  %v428_v24 = vld [vmem:[%s2449_s2 + $0x28] sm:$0xff] }
  0x3a   : > { %443 = vperm.xlu1 %1801, %v425_v13   ;;  %v429_v27 = vld [vmem:[%s2449_s2 + $0x30] sm:$0xff]  ;;  %v430_v28 = vld [vmem:[%s2449_s2 + $0x38] sm:$0xff]  ;;  %v694_v30 = vld [vmem:[%s2451_s4] sm:$0xff]  ;;  %s1432_s8 = sshll.u32 %s322_s30, 2  ;;  %s2402_s17 = scalar_lea.hbm %s2454_s7, %s1493_s16 }
  0x3b   : > { %s1496_s22 = sshll.u32 %s326_s19, 5  ;;  %v695_v31 = vld [vmem:[%s2451_s4 + $0x8] sm:$0xff]  ;;  %v696_v34 = vld [vmem:[%s2451_s4 + $0x10] sm:$0xff]  ;;  %v697_v35 = vld [vmem:[%s2451_s4 + $0x18] sm:$0xff]  ;;  %s1309_s20 = scalar_lea.sflag [#allocation4], %s322_s30 }
  0x3c   : > { %s332_s18 = scalar_lea.vmem %s2447_s0, %s1496_s22  ;;  %v698_v39 = vld [vmem:[%s2451_s4 + $0x20] sm:$0xff]  ;;  %v699_v40 = vld [vmem:[%s2451_s4 + $0x28] sm:$0xff]  ;;  %v700_v46 = vld [vmem:[%s2451_s4 + $0x30] sm:$0xff]  ;;  %p2466_p10 = scmp.ne.s32.totalorder %s2459_s11, 0 }
  0x3d   : > { %v1498_v1 = vld [vmem:[%s332_s18] sm:$0xff]   ;;  %v1513_v2 = vld [vmem:[%s332_s18 + $0x8] sm:$0xff]   ;;  %v1514_v6 = vld [vmem:[%s332_s18 + $0x10] sm:$0xff]   ;;  %438 = vperm.xlu0 %1800, %v424_v17   ;;  %s1941_s27 = smov [#allocation5]  }
  0x3e   : > { %v2080_v3 = vunpack.c.l.bf16 %v1498_v1  ;;  %v2082_v4 = vunpack.c.h.bf16 %v1498_v1  ;;  %v2084_v5 = vunpack.c.l.bf16 %v1513_v2  ;;  %v2089_v8 = vunpack.c.h.bf16 %v1513_v2  ;;  %v1515_v14 = vld [vmem:[%s332_s18 + $0x18] sm:$0xff]   ;;  %448 = vperm.xlu1 %1801, %v426_v18   ;;  %v1459_v55 = vld [vmem:[%s2449_s2 + $0x40] sm:$0xff]  ;;  %v1460_v56 = vld [vmem:[%s2449_s2 + $0x48] sm:$0xff]  ;;  %s324_s18 = scalar_lea.vmem [#allocation5], %s1432_s8  ;;  %s1854_s23 = sshll.u32 %s1941_s27, 4  ;;  %s1855_s23 = int_to_ptr.vmem [resolvable:$false] %s1854_s23 }
  0x3f   : > { %v2094_v10 = vunpack.c.l.bf16 %v1514_v6  ;;  %v2103_v15 = vunpack.c.h.bf16 %v1514_v6  ;;  %v2112_v19 = vunpack.c.l.bf16 %v1515_v14  ;;  %v2115_v21 = vunpack.c.h.bf16 %v1515_v14  ;;  %v701_v47 = vld [vmem:[%s2451_s4 + $0x38] sm:$0xff]  ;;  %v1461_v63 = vld [vmem:[%s2449_s2 + $0x50] sm:$0xff]  ;;  %s1323_s15 = sshll.u32 %s324_s18, 4  ;;  %s1856_s19 = scalar_lea.vmem %s1855_s23, 128  ;;  %s2397_s15 = int_to_ptr.vmem [resolvable:$true] %s1323_s15 }
  0x40   : > { %v356_v9 = vadd.f32 %v2082_v4, %v2080_v3  ;;  %v1462_v0 = vld [vmem:[%s2449_s2 + $0x58] sm:$0xff]  ;;  %v1465_v14 = vld [vmem:[%s2449_s2 + $0x70] sm:$0xff]  ;;  %s1850_s21 = scalar_lea.vmem %s2397_s15, 64  ;;  %p1857_p1 = scmp.lt.s32.totalorder %s2397_s15, %s1855_s23 }
  0x41   : > { %453 = vperm.xlu0 %1800, %v427_v23   ;;  %p1851_p8 = scmp.ne.s32.totalorder %s2397_s15, %s1850_s21  ;;  %p1858_p3 = scmp.lt.s32.totalorder %s1856_s19, %s1850_s21 }
  0x42   : > { %v357_v11 = vadd.f32 %v2084_v5, %v356_v9  ;;  %458 = vperm.xlu1 %1801, %v428_v24   ;;  %v1463_v9 = vld [vmem:[%s2449_s2 + $0x60] sm:$0xff] }
  0x43   : > { %p1852_p11 = pnand %p1851_p8, %p2466_p10  ;;  %p1859_p5 = por %p1858_p3, %p1857_p1 }
  0x44   : > { %v358_v16 = vadd.f32 %v2089_v8, %v357_v11  ;;  %v1464_v11 = vld [vmem:[%s2449_s2 + $0x68] sm:$0xff] }
  0x45   : > { %463 = vperm.xlu0 %1800, %v429_v27   ;;  %p1853_p13 = pneg %p1852_p11 }
  0x46   : > { %v359_v20 = vadd.f32 %v2094_v10, %v358_v16  ;;  %468 = vperm.xlu1 %1801, %v430_v28   ;;  %v1466_v16 = vld [vmem:[%s2449_s2 + $0x78] sm:$0xff] }
  0x47   : > { %p1860_p6 = pnand %p1859_p5, %p1853_p13 }
  0x48   : > { %v360_v22 = vadd.f32 %v2103_v15, %v359_v20  ;;  %v1483_v20 = vld [vmem:[%s2451_s4 + $0x40] sm:$0xff] }
  0x49   : > { %704 = vperm.xlu0 %1800, %v694_v30   ;;  %v1488_v30 = vld [vmem:[%s2451_s4 + $0x68] sm:$0xff] }
  0x4a   : > { %v361_v25 = vadd.f32 %v2112_v19, %v360_v22  ;;  %709 = vperm.xlu1 %1801, %v695_v31   ;;  %v1484_v22 = vld [vmem:[%s2451_s4 + $0x48] sm:$0xff] }
  0x4c   : > { %v362_v26 = vadd.f32 %v2115_v21, %v361_v25  ;;  %v1485_v25 = vld [vmem:[%s2451_s4 + $0x50] sm:$0xff] }
  0x4d   : > { %714 = vperm.xlu0 %1800, %v696_v34   ;;  %v1490_v34 = vld [vmem:[%s2451_s4 + $0x78] sm:$0xff] }
  0x4e   : > { %v363_v29 = vrot.slane %v362_v26, 4  ;;  %719 = vperm.xlu1 %1801, %v697_v35  }
  0x50   : > { %v364_v32 = vadd.f32 %v363_v29, %v362_v26  ;;  %v1486_v26 = vld [vmem:[%s2451_s4 + $0x58] sm:$0xff]  ;;  %v1487_v29 = vld [vmem:[%s2451_s4 + $0x60] sm:$0xff] }
  0x51   : > { %724 = vperm.xlu0 %1800, %v698_v39  }
  0x52   : > { %v365_v33 = vrot.slane %v364_v32, 2  ;;  %729 = vperm.xlu1 %1801, %v699_v40  }
  0x54   : > { %v366_v36 = vadd.f32 %v365_v33, %v364_v32  ;;  %v1489_v33 = vld [vmem:[%s2451_s4 + $0x70] sm:$0xff] }
  0x55   : > { %734 = vperm.xlu0 %1800, %v700_v46  }
  0x56   : > { %v367_v37 = vrot.slane %v366_v36, 1  ;;  %739 = vperm.xlu1 %1801, %v701_v47  }
  0x58   : > { %v368_v38 = vadd.f32 %v367_v37, %v366_v36 }
  0x59   : > { %829 = vperm.xlu0 %1800, %v1459_v55  }
  0x5a   : > { %v369_v41 = vmul.f32 0.015625, %v368_v38  ;;  %834 = vperm.xlu1 %1801, %v1460_v56  }
  0x5c   : > { %v2151_v42 = vsub.f32 %v2080_v3, %v369_v41  ;;  %v2154_v43 = vsub.f32 %v2082_v4, %v369_v41  ;;  %v2157_v44 = vsub.f32 %v2084_v5, %v369_v41  ;;  %v2160_v45 = vsub.f32 %v2089_v8, %v369_v41 }
  0x5d   : > { %v2169_v48 = vsub.f32 %v2094_v10, %v369_v41  ;;  %v2178_v52 = vsub.f32 %v2103_v15, %v369_v41  ;;  %v2189_v57 = vsub.f32 %v2112_v19, %v369_v41  ;;  %v377_v60 = vsub.f32 %v2115_v21, %v369_v41  ;;  %839 = vperm.xlu0 %1800, %v1461_v63  }
  0x5e   : > { %v378_v49 = vmul.f32 %v2151_v42, %v2151_v42  ;;  %v379_v50 = vmul.f32 %v2154_v43, %v2154_v43  ;;  %v380_v51 = vmul.f32 %v2157_v44, %v2157_v44  ;;  %v381_v53 = vmul.f32 %v2160_v45, %v2160_v45  ;;  %844 = vperm.xlu1 %1801, %v1462_v0  }
  0x5f   : > { %v382_v58 = vmul.f32 %v2169_v48, %v2169_v48  ;;  %v383_v61 = vmul.f32 %v2178_v52, %v2178_v52  ;;  %v384_v1 = vmul.f32 %v2189_v57, %v2189_v57  ;;  %v385_v6 = vmul.f32 %v377_v60, %v377_v60 }
  0x60   : > { %v386_v54 = vadd.f32 %v379_v50, %v378_v49 }
  0x61   : > { %849 = vperm.xlu0 %1800, %v1463_v9  }
  0x62   : > { %v387_v59 = vadd.f32 %v386_v54, %v380_v51  ;;  %854 = vperm.xlu1 %1801, %v1464_v11  }
  0x64   : > { %v388_v62 = vadd.f32 %v387_v59, %v381_v53 }
  0x65   : > { %859 = vperm.xlu0 %1800, %v1465_v14  }
  0x66   : > { %v389_v2 = vadd.f32 %v388_v62, %v382_v58  ;;  %864 = vperm.xlu1 %1801, %v1466_v16  }
  0x68   : > { %v390_v7 = vadd.f32 %v389_v2, %v383_v61 }
  0x69   : > { %1101 = vperm.xlu0 %1800, %v1483_v20  }
  0x6a   : > { %v391_v12 = vadd.f32 %v390_v7, %v384_v1  ;;  %1106 = vperm.xlu1 %1801, %v1484_v22  }
  0x6c   : > { %v392_v13 = vadd.f32 %v391_v12, %v385_v6 }
  0x6d   : > { %1111 = vperm.xlu0 %1800, %v1485_v25  }
  0x6e   : > { %v393_v17 = vrot.slane %v392_v13, 4  ;;  %1116 = vperm.xlu1 %1801, %v1486_v26  }
  0x70   : > { %v394_v18 = vadd.f32 %v393_v17, %v392_v13 }
  0x71   : > { %1121 = vperm.xlu0 %1800, %v1487_v29  }
  0x72   : > { %v395_v23 = vrot.slane %v394_v18, 2  ;;  %1126 = vperm.xlu1 %1801, %v1488_v30  }
  0x74   : > { %v396_v24 = vadd.f32 %v395_v23, %v394_v18 }
  0x75   : > { %1131 = vperm.xlu0 %1800, %v1489_v33   ;;  %v1807_v33 = vld [vmem:[#allocation2 + $0x8] sm:$0xff]  }
  0x76   : > { %v397_v27 = vrot.slane %v396_v24, 1  ;;  %1136 = vperm.xlu1 %1801, %v1490_v34   ;;  %v1808_v34 = vld [vmem:[#allocation2 + $0x10] sm:$0xff]  }
  0x78   : > { %v398_v28 = vadd.f32 %v397_v27, %v396_v24 }
  0x7a   : > { %v399_v31 = vmul.f32 0.015625, %v398_v28 }
  0x7c   : > { %v400_v32 = vmax.f32 %v399_v31, 0.0 }
  0x7e   : > { %v401_v35 = vadd.f32 1e-05, %v400_v32 }
  0x80   : > { %1818 = vrsqrt.f32 %v401_v35  ;;  %v1809_v35 = vld [vmem:[#allocation2 + $0x18] sm:$0xff]  }
  0x8a   : > { %v1819_v36 = vpop.eup %1818 }
  0x8b   : > { %v403_v37 = vmul.f32 %v1819_v36, %v2151_v42  ;;  %v404_v38 = vmul.f32 %v1819_v36, %v2154_v43  ;;  %v405_v39 = vmul.f32 %v1819_v36, %v2157_v44  ;;  %v406_v40 = vmul.f32 %v1819_v36, %v2160_v45  ;;  %v1803_v43 = vld [vmem:[%s2448_s1 + $0x8] sm:$0xff]   ;;  %v1804_v44 = vld [vmem:[%s2448_s1 + $0x10] sm:$0xff]   ;;  %v1805_v45 = vld [vmem:[%s2448_s1 + $0x18] sm:$0xff]  }
  0x8c   : > { %v407_v47 = vmul.f32 %v1819_v36, %v2169_v48  ;;  %v408_v49 = vmul.f32 %v1819_v36, %v2178_v52  ;;  %v409_v51 = vmul.f32 %v1819_v36, %v2189_v57  ;;  %v410_v53 = vmul.f32 %v1819_v36, %v377_v60  ;;  %v1806_v48 = vld [vmem:[#allocation2] sm:$0xff]  }
  0x8d   : > { %v419_v41 = vpack.c.bf16 %v404_v38, %v403_v37  ;;  %v420_v46 = vpack.c.bf16 %v406_v40, %v405_v39  ;;  %1598 = vmatprep.mubr.msk.bf16.mxu1 %vm491_vm0, %v1806_v48  ;;  %v1810_v36 = vld [vmem:[%s2448_s1 + $0x20] sm:$0xff]  }
  0x8e   : > { %v421_v50 = vpack.c.bf16 %v408_v49, %v407_v47  ;;  %v422_v42 = vpack.c.bf16 %v410_v53, %v409_v51 }
  0x8f   : > { %1574 = vmatprep.subr.bf16.mxu0 %v419_v41 }
  0x90   : > { %1575 = vmatpush3.bf16.msra.mxu0 %v419_v41 }
  0x91   : > { %1576 = vmatprep.subr.bf16.mxu0 %v420_v46 }
  0x94   : > { %1577 = vmatpush3.bf16.msra.mxu0 %v420_v46 }
  0x95   : > { %1578 = vmatprep.subr.bf16.mxu0 %v421_v50 }
  0x98   : > { %1579 = vmatpush3.bf16.msra.mxu0 %v421_v50 }
  0x99   : > { %1580 = vmatprep.subr.bf16.mxu0 %v422_v42 }
  0x9c   : > { %1581 = vmatpush3.bf16.msra.mxu0 %v422_v42 }
  0x9f   : > { %1583 = vmatmul.mubr.msk.bf16.vlgmr.msra.gmra.mrb[0].mxu0 %vm491_vm0, %v1803_v43 }
  0xa0   : > { %1586 = vmatprep.mubr.msk.bf16.mxu0 %vm491_vm0, %v1804_v44 }
  0xa7   : > { %1587 = vmatmul.mubr.msk.bf16.gmra.mrb[4].mxu0 %vm491_vm0, %v1805_v45 }
  0xa8   : > { %1614 = vmatprep.mubr.msk.bf16.mxu0 %vm491_vm0, %v1810_v36 }
  0xb8   : > { %v434_v52 = vpop.permute.xlu0 %433 }
  0xb9   : > { %v444_v54 = vpop.permute.xlu1 %443 }
  0xbc   : > { %v439_v55 = vpop.permute.xlu0 %438 }
  0xbd   : > { %v449_v56 = vpop.permute.xlu1 %448 }
  0xc0   : > { %v454_v60 = vpop.permute.xlu0 %453 }
  0xc1   : > { %v459_v1 = vpop.permute.xlu1 %458 }
  0xc4   : > { %v464_v13 = vpop.permute.xlu0 %463 }
  0xc5   : > { %v469_v20 = vpop.permute.xlu1 %468 }
  0xc8   : > { %v705_v37 = vpop.permute.xlu0 %704 }
  0xc9   : > { %v710_v38 = vpop.permute.xlu1 %709 }
  0xcc   : > { %v715_v47 = vpop.permute.xlu0 %714 }
  0xcd   : > { %v720_v53 = vpop.permute.xlu1 %719 }
 0x172   : > { %v1584_v57 = vpop.f32.mrb[0].mxu0 }
 0x173   : > { %v547_v58 = vadd.f32 %v1584_v57, %v444_v54  ;;  %v538_v59 = vpop.f32.mrb[1].mxu0  ;;  %v730_v57 = vpop.permute.xlu1 %729 }
 0x174   : > { %v539_v61 = vadd.f32 %v538_v59, %v434_v52  ;;  %v1585_v62 = vpop.f32.mrb[2].mxu0  ;;  %v725_v52 = vpop.permute.xlu0 %724 }
 0x175   : > { %v550_v63 = vadd.f32 %v1585_v62, %v449_v56  ;;  %v541_v0 = vpop.f32.mrb[3].mxu0  ;;  %v571_v6 = vmax.f32 %v547_v58, 0.0 }
 0x176   : > { %v542_v2 = vadd.f32 %v541_v0, %v439_v55  ;;  %v569_v9 = vmax.f32 %v539_v61, 0.0 }
 0x177   : > { %v572_v7 = vmax.f32 %v550_v63, 0.0 }
 0x178   : > { %v570_v11 = vmax.f32 %v542_v2, 0.0 }
 0x179   : > { %v586_v12 = vpack.c.bf16 %v572_v7, %v571_v6  ;;  %v740_v6 = vpop.permute.xlu1 %739 }
 0x17a   : > { %v1588_v14 = vpop.f32.mrb[4].mxu0  ;;  %v585_v16 = vpack.c.bf16 %v570_v11, %v569_v9 }
 0x17b   : > { %v563_v17 = vadd.f32 %v1588_v14, %v464_v13  ;;  %v554_v18 = vpop.f32.mrb[5].mxu0 }
 0x17c   : > { %v555_v22 = vadd.f32 %v554_v18, %v454_v60  ;;  %v1589_v23 = vpop.f32.mrb[6].mxu0  ;;  %1590 = vmatprep.subr.bf16.mxu1 %v585_v16 }
 0x17d   : > { %v566_v24 = vadd.f32 %v1589_v23, %v469_v20  ;;  %v557_v25 = vpop.f32.mrb[7].mxu0  ;;  %1591 = vmatpush3.bf16.msra.mxu1 %v585_v16  ;;  %v575_v27 = vmax.f32 %v563_v17, 0.0 }
 0x17e   : > { %v558_v26 = vadd.f32 %v557_v25, %v459_v1  ;;  %1592 = vmatprep.subr.bf16.mxu1 %v586_v12  ;;  %v573_v29 = vmax.f32 %v555_v22, 0.0  ;;  %v735_v1 = vpop.permute.xlu0 %734 }
 0x17f   : > { %v576_v28 = vmax.f32 %v566_v24, 0.0 }
 0x180   : > { %v574_v30 = vmax.f32 %v558_v26, 0.0 }
 0x181   : > { %v588_v31 = vpack.c.bf16 %v576_v28, %v575_v27  ;;  %1593 = vmatpush3.bf16.msra.mxu1 %v586_v12 }
 0x182   : > { %v587_v32 = vpack.c.bf16 %v574_v30, %v573_v29 }
 0x184   : > { %1594 = vmatprep.subr.bf16.mxu1 %v587_v32 }
 0x185   : > { %1595 = vmatpush3.bf16.msra.mxu1 %v587_v32 }
 0x186   : > { %1596 = vmatprep.subr.bf16.mxu1 %v588_v31 }
 0x189   : > { %1597 = vmatpush3.bf16.msra.mxu1 %v588_v31 }
 0x18c   : > { %1599 = vmatmul.mubr.msk.bf16.vlgmr.msra.gmra.mrb[0].mxu1 %vm491_vm0, %v1807_v33 }
 0x18d   : > { %1602 = vmatprep.mubr.msk.bf16.mxu1 %vm491_vm0, %v1808_v34 }
 0x194   : > { %1603 = vmatmul.mubr.msk.bf16.gmra.mrb[4].mxu1 %vm491_vm0, %v1809_v35 }
 0x25f   : > { %v1600_v39 = vpop.f32.mrb[0].mxu1 }
 0x260   : > { %v655_v40 = vpop.f32.mrb[1].mxu1  ;;  %v688_v50 = vadd.f32 %v1600_v39, %v2084_v5 }
 0x261   : > { %v686_v41 = vadd.f32 %v2080_v3, %v655_v40  ;;  %v1601_v46 = vpop.f32.mrb[2].mxu1 }
 0x262   : > { %v658_v49 = vpop.f32.mrb[3].mxu1  ;;  %v689_v43 = vadd.f32 %v1601_v46, %v2089_v8  ;;  %v2275_v45 = vadd.f32 %v715_v47, %v688_v50 }
 0x263   : > { %v687_v51 = vadd.f32 %v2082_v4, %v658_v49  ;;  %v2270_v42 = vadd.f32 %v705_v37, %v686_v41 }
 0x264   : > { %v2279_v55 = vadd.f32 %v720_v53, %v689_v43 }
 0x265   : > { %v2273_v44 = vadd.f32 %v710_v38, %v687_v51 }
 0x267   : > { %v750_v48 = vadd.f32 %v2273_v44, %v2270_v42  ;;  %v1604_v3 = vpop.f32.mrb[4].mxu1 }
 0x268   : > { %v671_v54 = vpop.f32.mrb[5].mxu1  ;;  %v692_v8 = vadd.f32 %v1604_v3, %v2112_v19 }
 0x269   : > { %v751_v5 = vadd.f32 %v750_v48, %v2275_v45  ;;  %v690_v4 = vadd.f32 %v2094_v10, %v671_v54  ;;  %v1605_v56 = vpop.f32.mrb[6].mxu1 }
 0x26a   : > { %v674_v58 = vpop.f32.mrb[7].mxu1  ;;  %v693_v63 = vadd.f32 %v1605_v56, %v2115_v21  ;;  %v2292_v2 = vadd.f32 %v735_v1, %v692_v8 }
 0x26b   : > { %v2284_v59 = vadd.f32 %v725_v52, %v690_v4  ;;  %v752_v60 = vadd.f32 %v751_v5, %v2279_v55  ;;  %v691_v61 = vadd.f32 %v2103_v15, %v674_v58 }
 0x26c   : > { %v2295_v7 = vadd.f32 %v740_v6, %v693_v63  ;;  %v1812_v6 = vld [vmem:[%s2448_s1 + $0x30] sm:$0xff]  }
 0x26d   : > { %v753_v62 = vadd.f32 %v752_v60, %v2284_v59  ;;  %v2290_v0 = vadd.f32 %v730_v57, %v691_v61 }
 0x26f   : > { %v754_v10 = vadd.f32 %v753_v62, %v2290_v0 }
 0x271   : > { %v755_v19 = vadd.f32 %v754_v10, %v2292_v2  ;;  %v1811_v10 = vld [vmem:[%s2448_s1 + $0x28] sm:$0xff]  }
 0x273   : > { %v756_v9 = vadd.f32 %v755_v19, %v2295_v7  ;;  %v1813_v19 = vld [vmem:[%s2448_s1 + $0x38] sm:$0xff]  }
 0x275   : > { %v757_v11 = vrot.slane %v756_v9, 4 }
 0x277   : > { %v758_v15 = vadd.f32 %v757_v11, %v756_v9  ;;  %v1814_v9 = vld [vmem:[#allocation2 + $0x20] sm:$0xff]   ;;  %v830_v11 = vpop.permute.xlu0 %829 }
 0x278   : > { %1630 = vmatprep.mubr.msk.bf16.mxu1 %vm491_vm0, %v1814_v9 }
 0x279   : > { %v759_v12 = vrot.slane %v758_v15, 2 }
 0x27b   : > { %v760_v13 = vadd.f32 %v759_v12, %v758_v15  ;;  %v835_v15 = vpop.permute.xlu1 %834  ;;  %v840_v12 = vpop.permute.xlu0 %839 }
 0x27d   : > { %v761_v14 = vrot.slane %v760_v13, 1 }
 0x27f   : > { %v762_v21 = vadd.f32 %v761_v14, %v760_v13  ;;  %v845_v13 = vpop.permute.xlu1 %844 }
 0x281   : > { %v763_v16 = vmul.f32 0.015625, %v762_v21 }
 0x283   : > { %v764_v17 = vsub.f32 %v2270_v42, %v763_v16  ;;  %v765_v18 = vsub.f32 %v2273_v44, %v763_v16  ;;  %v766_v20 = vsub.f32 %v2275_v45, %v763_v16  ;;  %v767_v22 = vsub.f32 %v2279_v55, %v763_v16 }
 0x284   : > { %v768_v25 = vsub.f32 %v2284_v59, %v763_v16  ;;  %v769_v28 = vsub.f32 %v2290_v0, %v763_v16  ;;  %v770_v31 = vsub.f32 %v2292_v2, %v763_v16  ;;  %v771_v35 = vsub.f32 %v2295_v7, %v763_v16 }
 0x285   : > { %v772_v23 = vmul.f32 %v764_v17, %v764_v17  ;;  %v773_v24 = vmul.f32 %v765_v18, %v765_v18  ;;  %v774_v26 = vmul.f32 %v766_v20, %v766_v20  ;;  %v775_v29 = vmul.f32 %v767_v22, %v767_v22 }
 0x286   : > { %v776_v32 = vmul.f32 %v768_v25, %v768_v25  ;;  %v777_v34 = vmul.f32 %v769_v28, %v769_v28  ;;  %v778_v37 = vmul.f32 %v770_v31, %v770_v31  ;;  %v779_v39 = vmul.f32 %v771_v35, %v771_v35 }
 0x287   : > { %v780_v27 = vadd.f32 %v773_v24, %v772_v23  ;;  %v855_v24 = vpop.permute.xlu1 %854 }
 0x289   : > { %v781_v30 = vadd.f32 %v780_v27, %v774_v26 }
 0x28b   : > { %v782_v33 = vadd.f32 %v781_v30, %v775_v29 }
 0x28d   : > { %v783_v36 = vadd.f32 %v782_v33, %v776_v32 }
 0x28f   : > { %v784_v38 = vadd.f32 %v783_v36, %v777_v34  ;;  %v865_v36 = vpop.permute.xlu1 %864 }
 0x291   : > { %v785_v40 = vadd.f32 %v784_v38, %v778_v37 }
 0x293   : > { %v786_v41 = vadd.f32 %v785_v40, %v779_v39 }
 0x295   : > { %v787_v46 = vrot.slane %v786_v41, 4 }
 0x297   : > { %v788_v47 = vadd.f32 %v787_v46, %v786_v41 }
 0x299   : > { %v789_v49 = vrot.slane %v788_v47, 2 }
 0x29b   : > { %v790_v50 = vadd.f32 %v789_v49, %v788_v47 }
 0x29d   : > { %v791_v51 = vrot.slane %v790_v50, 1 }
 0x29f   : > { %v792_v53 = vadd.f32 %v791_v51, %v790_v50 }
 0x2a1   : > { %v793_v43 = vmul.f32 0.015625, %v792_v53 }
 0x2a3   : > { %v794_v48 = vmax.f32 %v793_v43, 0.0  ;;  %v1815_v43 = vld [vmem:[#allocation2 + $0x28] sm:$0xff]  }
 0x2a5   : > { %v795_v3 = vadd.f32 1e-05, %v794_v48  ;;  %v1816_v48 = vld [vmem:[#allocation2 + $0x30] sm:$0xff]  }
 0x2a7   : > { %1820 = vrsqrt.f32 %v795_v3  ;;  %v1817_v3 = vld [vmem:[#allocation2 + $0x38] sm:$0xff]  }
 0x2b1   : > { %v1821_v52 = vpop.eup %1820 }
 0x2b2   : > { %v797_v54 = vmul.f32 %v1821_v52, %v764_v17  ;;  %v798_v5 = vmul.f32 %v1821_v52, %v765_v18  ;;  %v799_v4 = vmul.f32 %v1821_v52, %v766_v20  ;;  %v800_v56 = vmul.f32 %v1821_v52, %v767_v22  ;;  %v850_v17 = vpop.permute.xlu0 %849 }
 0x2b3   : > { %v801_v8 = vmul.f32 %v1821_v52, %v768_v25  ;;  %v802_v60 = vmul.f32 %v1821_v52, %v769_v28  ;;  %v803_v62 = vmul.f32 %v1821_v52, %v770_v31  ;;  %v804_v63 = vmul.f32 %v1821_v52, %v771_v35 }
 0x2b4   : > { %v814_v57 = vpack.c.bf16 %v798_v5, %v797_v54  ;;  %v815_v58 = vpack.c.bf16 %v800_v56, %v799_v4  ;;  %v1938_v52 = vmov 0.0|0.0   ;;  %v1940_v54 = vmov 0.0   ;;  %v1221_v5 = vld [vmem:[%s2453_s6] sm:$0xff]  ;;  %v1222_v4 = vld [vmem:[%s2453_s6 + $0x8] sm:$0xff]  ;;  %v1223_v56 = vld [vmem:[%s2453_s6 + $0x10] sm:$0xff] }
 0x2b5   : > { %v816_v61 = vpack.c.bf16 %v802_v60, %v801_v8  ;;  %v817_v1 = vpack.c.bf16 %v804_v63, %v803_v62  ;;  %v1225_v60 = vld [vmem:[%s2453_s6 + $0x20] sm:$0xff]  ;;  %v1227_v63 = vld [vmem:[%s2453_s6 + $0x30] sm:$0xff] }
 0x2b6   : > { %1606 = vmatprep.subr.bf16.mxu0 %v814_v57  ;;  %v860_v31 = vpop.permute.xlu0 %859 }
 0x2b7   : > { %1607 = vmatpush3.bf16.msra.mxu0 %v814_v57  ;;  %v1705_v57 = vpack.c.bf16 %v1222_v4, %v1221_v5 }
 0x2b8   : > { %1608 = vmatprep.subr.bf16.mxu0 %v815_v58 }
 0x2bb   : > { %1609 = vmatpush3.bf16.msra.mxu0 %v815_v58  ;;  %v1224_v58 = vld [vmem:[%s2453_s6 + $0x18] sm:$0xff] }
 0x2bc   : > { %1610 = vmatprep.subr.bf16.mxu0 %v816_v61  ;;  %v1708_v8 = vpack.c.bf16 %v1224_v58, %v1223_v56 }
 0x2bf   : > { %1611 = vmatpush3.bf16.msra.mxu0 %v816_v61  ;;  %v1226_v61 = vld [vmem:[%s2453_s6 + $0x28] sm:$0xff] }
 0x2c0   : > { %1612 = vmatprep.subr.bf16.mxu0 %v817_v1  ;;  %v1711_v62 = vpack.c.bf16 %v1226_v61, %v1225_v60 }
 0x2c3   : > { %1613 = vmatpush3.bf16.msra.mxu0 %v817_v1  ;;  %v1228_v1 = vld [vmem:[%s2453_s6 + $0x38] sm:$0xff] }
 0x2c4   : > { %1692 = vmatprep.subr.bf16.mxu0 %v1938_v52 }
 0x2c6   : > { %1615 = vmatmul.mubr.msk.bf16.vlgmr.msra.gmra.mrb[8].mxu0 %vm491_vm0, %v1811_v10  ;;  %v1714_v10 = vpack.c.bf16 %v1228_v1, %v1227_v63 }
 0x2c7   : > { %1618 = vmatprep.mubr.msk.bf16.mxu0 %vm491_vm0, %v1812_v6  ;;  %v1229_v6 = vld [vmem:[%s2453_s6 + $0x40] sm:$0xff] }
 0x2ce   : > { %1619 = vmatmul.mubr.msk.bf16.gmra.mrb[12].mxu0 %vm491_vm0, %v1813_v19  ;;  %v1230_v19 = vld [vmem:[%s2453_s6 + $0x48] sm:$0xff] }
 0x2cf   : > { %1654 = vmatprep.mubr.msk.f32.mxu0 %vm1939_vm1, %v1940_v54  ;;  %v1717_v9 = vpack.c.bf16 %v1230_v19, %v1229_v6 }
 0x399   : > { %v1616_v14 = vpop.f32.mrb[8].mxu0 }
 0x39a   : > { %v942_v21 = vadd.f32 %v1616_v14, %v840_v12  ;;  %v933_v16 = vpop.f32.mrb[9].mxu0  ;;  %v1234_v14 = vld [vmem:[%s2453_s6 + $0x68] sm:$0xff] }
 0x39b   : > { %v934_v18 = vadd.f32 %v933_v16, %v830_v11  ;;  %v1617_v20 = vpop.f32.mrb[10].mxu0  ;;  %v1231_v11 = vld [vmem:[%s2453_s6 + $0x50] sm:$0xff] }
 0x39c   : > { %v945_v22 = vadd.f32 %v1617_v20, %v845_v13  ;;  %v936_v23 = vpop.f32.mrb[11].mxu0  ;;  %v966_v26 = vmax.f32 %v942_v21, 0.0  ;;  %v1233_v13 = vld [vmem:[%s2453_s6 + $0x60] sm:$0xff]  ;;  %v1235_v16 = vld [vmem:[%s2453_s6 + $0x70] sm:$0xff]  ;;  %v1102_v20 = vpop.permute.xlu0 %1101 }
 0x39d   : > { %v937_v25 = vadd.f32 %v936_v23, %v835_v15  ;;  %v964_v28 = vmax.f32 %v934_v18, 0.0  ;;  %v1232_v15 = vld [vmem:[%s2453_s6 + $0x58] sm:$0xff]  ;;  %v1723_v21 = vpack.c.bf16 %v1234_v14, %v1233_v13 }
 0x39e   : > { %v967_v27 = vmax.f32 %v945_v22, 0.0  ;;  %v1720_v12 = vpack.c.bf16 %v1232_v15, %v1231_v11  ;;  %v1107_v22 = vpop.permute.xlu1 %1106 }
 0x39f   : > { %v965_v29 = vmax.f32 %v937_v25, 0.0 }
 0x3a0   : > { %v982_v30 = vpack.c.bf16 %v967_v27, %v966_v26  ;;  %v1112_v23 = vpop.permute.xlu0 %1111 }
 0x3a1   : > { %v981_v32 = vpack.c.bf16 %v965_v29, %v964_v28  ;;  %v1620_v33 = vpop.f32.mrb[12].mxu0 }
 0x3a2   : > { %v958_v34 = vadd.f32 %v1620_v33, %v860_v31  ;;  %v949_v35 = vpop.f32.mrb[13].mxu0 }
 0x3a3   : > { %v950_v37 = vadd.f32 %v949_v35, %v850_v17  ;;  %v1621_v38 = vpop.f32.mrb[14].mxu0  ;;  %1622 = vmatprep.subr.bf16.mxu1 %v981_v32  ;;  %v1236_v17 = vld [vmem:[%s2453_s6 + $0x78] sm:$0xff] }
 0x3a4   : > { %v961_v39 = vadd.f32 %v1621_v38, %v865_v36  ;;  %v952_v40 = vpop.f32.mrb[15].mxu0  ;;  %1623 = vmatpush3.bf16.msra.mxu1 %v981_v32  ;;  %v970_v46 = vmax.f32 %v958_v34, 0.0  ;;  %v1726_v18 = vpack.c.bf16 %v1236_v17, %v1235_v16  ;;  %v1122_v35 = vpop.permute.xlu0 %1121 }
 0x3a5   : > { %v953_v41 = vadd.f32 %v952_v40, %v855_v24  ;;  %1624 = vmatprep.subr.bf16.mxu1 %v982_v30  ;;  %v968_v49 = vmax.f32 %v950_v37, 0.0  ;;  %v1117_v24 = vpop.permute.xlu1 %1116 }
 0x3a6   : > { %v971_v47 = vmax.f32 %v961_v39, 0.0 }
 0x3a7   : > { %v969_v50 = vmax.f32 %v953_v41, 0.0 }
 0x3a8   : > { %v984_v51 = vpack.c.bf16 %v971_v47, %v970_v46  ;;  %1625 = vmatpush3.bf16.msra.mxu1 %v982_v30 }
 0x3a9   : > { %v983_v53 = vpack.c.bf16 %v969_v50, %v968_v49  ;;  %v1127_v36 = vpop.permute.xlu1 %1126 }
 0x3ab   : > { %1626 = vmatprep.subr.bf16.mxu1 %v983_v53 }
 0x3ac   : > { %1627 = vmatpush3.bf16.msra.mxu1 %v983_v53 }
 0x3ad   : > { %1628 = vmatprep.subr.bf16.mxu1 %v984_v51  ;;  %v1137_v50 = vpop.permute.xlu1 %1136 }
 0x3b0   : > { %1629 = vmatpush3.bf16.msra.mxu1 %v984_v51 }
 0x3b1   : > { %1704 = vmatprep.subr.bf16.mxu1 %v1938_v52 }
 0x3b3   : > { %1631 = vmatmul.mubr.msk.bf16.vlgmr.msra.gmra.mrb[8].mxu1 %vm491_vm0, %v1815_v43 }
 0x3b4   : > { %1634 = vmatprep.mubr.msk.bf16.mxu1 %vm491_vm0, %v1816_v48  ;;  %1706 = vmatpush3.bf16.msra.mxu1 %v1705_v57 }
 0x3b5   : > { %1707 = vmatprep.subr.bf16.mxu1 %v1938_v52 }
 0x3b8   : > { %1709 = vmatpush3.bf16.msra.mxu1 %v1708_v8 }
 0x3b9   : > { %1710 = vmatprep.subr.bf16.mxu1 %v1938_v52 }
 0x3bb   : > { %1635 = vmatmul.mubr.msk.bf16.gmra.mrb[12].mxu1 %vm491_vm0, %v1817_v3 }
 0x3bc   : > { %1689 = vmatprep.mubr.msk.f32.mxu1 %vm1939_vm1, %v1940_v54  ;;  %1712 = vmatpush3.bf16.msra.mxu1 %v1711_v62 }
 0x3bd   : > { %1713 = vmatprep.subr.bf16.mxu1 %v1938_v52 }
 0x3c0   : > { %1715 = vmatpush3.bf16.msra.mxu1 %v1714_v10 }
 0x3c1   : > { %1716 = vmatprep.subr.bf16.mxu1 %v1938_v52 }
 0x3c4   : > { %1718 = vmatpush3.bf16.msra.mxu1 %v1717_v9 }
 0x3c5   : > { %1719 = vmatprep.subr.bf16.mxu1 %v1938_v52 }
 0x3c8   : > { %1721 = vmatpush3.bf16.msra.mxu1 %v1720_v12 }
 0x3c9   : > { %1722 = vmatprep.subr.bf16.mxu1 %v1938_v52 }
 0x3cc   : > { %1724 = vmatpush3.bf16.msra.mxu1 %v1723_v21 }
 0x3cd   : > { %1725 = vmatprep.subr.bf16.mxu1 %v1938_v52 }
 0x3d0   : > { %1727 = vmatpush3.bf16.msra.mxu1 %v1726_v18 }
 0x486   : > { %v1632_v25 = vpop.f32.mrb[8].mxu1 }
 0x487   : > { %v1084_v26 = vadd.f32 %v1632_v25, %v2275_v45  ;;  %v1051_v27 = vpop.f32.mrb[9].mxu1 }
 0x488   : > { %v1082_v28 = vadd.f32 %v1051_v27, %v2270_v42  ;;  %v1633_v29 = vpop.f32.mrb[10].mxu1 }
 0x489   : > { %v1085_v30 = vadd.f32 %v1633_v29, %v2279_v55  ;;  %v1054_v31 = vpop.f32.mrb[11].mxu1  ;;  %v1141_v33 = vadd.f32 %v1112_v23, %v1084_v26 }
 0x48a   : > { %v1083_v32 = vadd.f32 %v1054_v31, %v2273_v44  ;;  %v1139_v37 = vadd.f32 %v1102_v20, %v1082_v28  ;;  %v1132_v44 = vpop.permute.xlu0 %1131 }
 0x48b   : > { %v1142_v34 = vadd.f32 %v1117_v24, %v1085_v30 }
 0x48c   : > { %v1140_v38 = vadd.f32 %v1107_v22, %v1083_v32 }
 0x48d   : > { %v1696_v39 = vpack.c.bf16 %v1142_v34, %v1141_v33 }
 0x48e   : > { %v1693_v40 = vpack.c.bf16 %v1140_v38, %v1139_v37  ;;  %v1636_v41 = vpop.f32.mrb[12].mxu1 }
 0x48f   : > { %v1088_v45 = vadd.f32 %v1636_v41, %v2292_v2  ;;  %v1067_v46 = vpop.f32.mrb[13].mxu1 }
 0x490   : > { %v1086_v42 = vadd.f32 %v1067_v46, %v2284_v59  ;;  %v1637_v47 = vpop.f32.mrb[14].mxu1  ;;  %1694 = vmatpush3.bf16.msra.mxu0 %v1693_v40 }
 0x491   : > { %v1089_v55 = vadd.f32 %v1637_v47, %v2295_v7  ;;  %v1070_v49 = vpop.f32.mrb[15].mxu1  ;;  %1695 = vmatprep.subr.bf16.mxu0 %v1938_v52  ;;  %v1145_v53 = vadd.f32 %v1132_v44, %v1088_v45  ;;  %v1147_v7 = vld [vmem:[%s2452_s5] sm:$0xf] }
 0x492   : > { %v1087_v51 = vadd.f32 %v1070_v49, %v2290_v0  ;;  %v1143_v48 = vadd.f32 %v1122_v35, %v1086_v42 }
 0x493   : > { %v1146_v43 = vadd.f32 %v1137_v50, %v1089_v55 }
 0x494   : > { %v1144_v3 = vadd.f32 %v1127_v36, %v1087_v51  ;;  %1697 = vmatpush3.bf16.msra.mxu0 %v1696_v39 }
 0x495   : > { %v1702_v2 = vpack.c.bf16 %v1146_v43, %v1145_v53  ;;  %1698 = vmatprep.subr.bf16.mxu0 %v1938_v52 }
 0x496   : > { %v1699_v59 = vpack.c.bf16 %v1144_v3, %v1143_v48 }
 0x498   : > { %1700 = vmatpush3.bf16.msra.mxu0 %v1699_v59 }
 0x499   : > { %1701 = vmatprep.subr.bf16.mxu0 %v1938_v52 }
 0x49c   : > { %1703 = vmatpush3.bf16.msra.mxu0 %v1702_v2 }
 0x49f   : > { %1655 = vmatmul.mubr.msk.f32.vlgmr.msra.gmra.mrb[16].mxu0 %vm491_vm0, %v1147_v7 }
 0x572   : > { %v1217_v0 = vpop.f32.mrb[16].mxu0 }
 0x573   : > { %v1656_v54 = vpop.f32.mrb[17].mxu0  ;;  %1690 = vmatmul.mubr.f32.vlgmr.msra.gmra.mrb[16].mxu1 %v1217_v0 }
 0x646   : > { %v1303_v52 = vpop.f32.mrb[16].mxu1 }
 0x647   : > { %1307 = vst [vmem:[%s324_s18] sm:$0xf] %v1303_v52  ;;  %v1691_v5 = vpop.f32.mrb[17].mxu1 }
 0x648   : > { %1863 = shalt.err (!%p1860_p6)
}
 0x649   : > { %s1864_s22 = scalar_lea.hbm %s2402_s17, 64  ;;  %s1868_s18 = scalar_lea.hbm %s2454_s7, 128 }
 0x64a   : > { %p1865_p7 = scmp.ne.s32.totalorder %s2402_s17, %s1864_s22  ;;  %p1869_p0 = scmp.lt.u32.totalorder %s2402_s17, %s2454_s7 }
 0x64b   : > { %p1870_p2 = scmp.lt.u32.totalorder %s1868_s18, %s1864_s22  ;;  %p1872_p8 = scmp.lt.u32.totalorder %s1864_s22, %s2402_s17 }
 0x64c   : > { %p1866_p9 = pnand %p1865_p7, %p2466_p10 }
 0x64d   : > { %p1871_p4 = por %p1870_p2, %p1869_p0 }
 0x64e   : > { %p1867_p12 = pneg %p1866_p9 }
 0x64f   : > { %p1873_p11 = por %p1872_p8, %p1871_p4 }
 0x651   : > { %p1874_p13 = pnand %p1873_p11, %p1867_p12 }
 0x653   : > { %1877 = shalt.err (!%p1874_p13)
}
 0x654   : > { %1732 = dma.vmem_to_hbm [thread:$0]  (%p2466_p10), %s2397_s15, 64, %s2402_s17, %s1309_s20  }
 0x655 PF: > { %p1744_p1 = scmp.ge.s32.totalorder %s1932_s29, 2  ;;  %s1335_s12 = sand.u32 1, %s1912_s24  }
 0x656   : > { %p2467_p3 = scmp.ne.s32.totalorder %s2460_s13, 0  ;;  %s1336_s21 = scalar_lea.sflag [#allocation4], %s1335_s12 }
 0x658   : > { %p1739_p5 = pnand %p1744_p1, %p2467_p3 }
 0x65a   : > { %1907 = dma.done.wait (!%p1739_p5), %s1336_s21, 64  }
 0x65b   : > { %1909 = vsyncadd (!%p1739_p5), %s1336_s21, 4294967232  ;;  %s21_s29 = sadd.s32 1, %s1932_s29   ;;  %s2468_s24 = smov %s1916_s25 }
 0x65c   : > { %p18_p6 = scmp.ge.s32.totalorder %s21_s29, 4   ;;  %s2469_s25 = smov %s1920_s26 }
 0x65d   : > { %s2470_s26 = smov %s2035_s14  ;;  %s2471_s27 = smov %s1928_s28 }
 0x65e   : > { %s2472_s28 = smov %s2474_s9  ;;  %20 = sbr.rel (!%p18_p6) target bundleno = 5 (0x5), region = 95 }
 0x665   :  { %1341 = vsyncpa [#allocation3], 1 }
 0x666   :  { %1343 = vsyncpa [#allocation3 + $0x1], 1 }
 0x667   :  { %1344 = vsyncpa [#allocation4], 1 }
 0x668   :  { %1346 = vsyncpa [#allocation4 + $0x1], 1 }

</bundles_post_ra>
